<compile_context>
chip_gen: v7x
topology: tpu7x:2x2x1
jax: 0.10.0
libtpu: 0.0.40
codegen_flags: <defaults>
</compile_context>

<pallas_src>
import math
import functools

import jax
import jax.numpy as jnp
import numpy as np
from jax.experimental import pallas as pl
from jax.experimental.pallas import tpu as pltpu

# ---------------- config (MPT-style) ----------------
D_MODEL = 128
N_HEADS = 4
HEAD_DIM = D_MODEL // N_HEADS
EXPANSION = 4
D_FFN = EXPANSION * D_MODEL
SEQ = 16
CLIP_QKV = 8.0
ALIBI_BIAS_MAX = 8
LN_EPS = 1e-5
SCALE = HEAD_DIM ** (-0.5)


def get_alibi_slopes(total_num_heads: int, alibi_bias_max: int) -> np.ndarray:
    next_power_of_2 = 2 ** math.ceil(math.log2(total_num_heads))
    m = np.arange(1, next_power_of_2 + 1, dtype=np.float32)
    m = m * (alibi_bias_max / next_power_of_2)
    slopes = 1.0 / np.power(2.0, m)
    if next_power_of_2 != total_num_heads:
        slopes = np.concatenate([slopes[1::2], slopes[::2]])[:total_num_heads]
    return slopes.astype(np.float32)


def _layernorm(v, g, b):
    mu = jnp.mean(v, axis=-1, keepdims=True)
    var = jnp.mean((v - mu) ** 2, axis=-1, keepdims=True)
    return (v - mu) * jax.lax.rsqrt(var + LN_EPS) * g + b


def mpt_block_kernel(x_ref, wqkv_ref, wout_ref, wup_ref, wdown_ref,
                     g1_ref, b1_ref, g2_ref, b2_ref, slopes_ref, o_ref):
    x = x_ref[...].astype(jnp.float32)                       # (S, D)
    S = x.shape[0]

    # ---- norm_1 (f32) ----
    h = _layernorm(x, g1_ref[...], b1_ref[...])

    # ---- fused QKV projection: bf16 weights, f32 accumulation ----
    qkv = jnp.dot(h.astype(jnp.bfloat16), wqkv_ref[...],
                  preferred_element_type=jnp.float32)        # (S, 3D)
    qkv = jnp.clip(qkv, -CLIP_QKV, CLIP_QKV)                 # clip_qkv
    q = qkv[:, 0 * D_MODEL:1 * D_MODEL]
    k = qkv[:, 1 * D_MODEL:2 * D_MODEL]
    v = qkv[:, 2 * D_MODEL:3 * D_MODEL]
    # qk_ln=False in this config, so no q_ln/k_ln.

    # head-batched views (H, S, HEAD_DIM) built from static lane slices
    qh = jnp.stack([q[:, i * HEAD_DIM:(i + 1) * HEAD_DIM] for i in range(N_HEADS)], axis=0)
    kh = jnp.stack([k[:, i * HEAD_DIM:(i + 1) * HEAD_DIM] for i in range(N_HEADS)], axis=0)
    vh = jnp.stack([v[:, i * HEAD_DIM:(i + 1) * HEAD_DIM] for i in range(N_HEADS)], axis=0)

    # ---- combined ALiBi + causal bias, built once: (H, S, S) ----
    row = jax.lax.broadcasted_iota(jnp.int32, (S, S), 0)     # query position i
    col = jax.lax.broadcasted_iota(jnp.int32, (S, S), 1)     # key position j
    causal = col <= row
    rel = (col - row).astype(jnp.float32)                    # (j - i) <= 0 under mask
    slopes = slopes_ref[...]                                 # (H, 1) f32
    bias = jnp.where(causal[None], slopes[:, :, None] * rel[None], -1e30)

    # ---- batched attention: 2 MXU pushes instead of 2 per head ----
    s = jnp.einsum('hqd,hkd->hqk', qh, kh,
                   preferred_element_type=jnp.float32) * SCALE + bias
    m = jnp.max(s, axis=-1, keepdims=True)
    p = jnp.exp(s - m)
    inv = pl.reciprocal(jnp.sum(p, axis=-1, keepdims=True), approx=True)
    p = p * inv
    attn_h = jnp.einsum('hqk,hkd->hqd', p, vh,
                        preferred_element_type=jnp.float32)  # (H, S, HEAD_DIM)
    attn = jnp.concatenate([attn_h[i] for i in range(N_HEADS)], axis=-1)  # (S, D)

    attn_out = jnp.dot(attn.astype(jnp.bfloat16), wout_ref[...],
                       preferred_element_type=jnp.float32)
    h1 = x + attn_out                                        # residual 1

    # ---- norm_2 + MLP ----
    h2 = _layernorm(h1, g2_ref[...], b2_ref[...])
    up = jnp.dot(h2.astype(jnp.bfloat16), wup_ref[...],
                 preferred_element_type=jnp.float32)
    # TODO(synk): PyTorch nn.GELU() is the exact erf GELU; tanh approximation used
    # for guaranteed Mosaic lowering (numerical diff < 1e-3).
    act = jax.nn.gelu(up, approximate=True)
    down = jnp.dot(act.astype(jnp.bfloat16), wdown_ref[...],
                   preferred_element_type=jnp.float32)

    o_ref[...] = (h1 + down).astype(o_ref.dtype)             # residual 2


@functools.partial(jax.jit, static_argnames=())
def mpt_block(x, wqkv, wout, wup, wdown, g1, b1, g2, b2, slopes):
    vmem = pl.BlockSpec(memory_space=pltpu.MemorySpace.VMEM)
    return pl.pallas_call(
        mpt_block_kernel,
        out_shape=jax.ShapeDtypeStruct(x.shape, x.dtype),
        in_specs=[vmem] * 10,
        out_specs=vmem,
    )(x, wqkv, wout, wup, wdown, g1, b1, g2, b2, slopes)


def mpt_block_ref(x, wqkv, wout, wup, wdown, g1, b1, g2, b2, slopes):
    """Pure-JAX reference mirroring the kernel math (bf16 matmul inputs, f32 acc)."""
    S = x.shape[0]
    h = _layernorm(x, g1, b1)
    qkv = jnp.clip(jnp.dot(h.astype(jnp.bfloat16), wqkv,
                           preferred_element_type=jnp.float32),
                   -CLIP_QKV, CLIP_QKV)
    q, k, v = jnp.split(qkv, 3, axis=-1)
    qh = q.reshape(S, N_HEADS, HEAD_DIM).transpose(1, 0, 2)
    kh = k.reshape(S, N_HEADS, HEAD_DIM).transpose(1, 0, 2)
    vh = v.reshape(S, N_HEADS, HEAD_DIM).transpose(1, 0, 2)
    s = jnp.einsum('hqd,hkd->hqk', qh, kh,
                   preferred_element_type=jnp.float32) * SCALE
    pos = jnp.arange(S)
    rel = (pos[None, :] - pos[:, None]).astype(jnp.float32)
    causal = pos[None, :] <= pos[:, None]
    s = s + jnp.where(causal[None], slopes[:, :, None] * rel[None], -1e30)
    p = jax.nn.softmax(s, axis=-1)
    attn = jnp.einsum('hqk,hkd->hqd', p, vh,
                      preferred_element_type=jnp.float32)
    attn = attn.transpose(1, 0, 2).reshape(S, D_MODEL)
    h1 = x + jnp.dot(attn.astype(jnp.bfloat16), wout,
                     preferred_element_type=jnp.float32)
    h2 = _layernorm(h1, g2, b2)
    up = jnp.dot(h2.astype(jnp.bfloat16), wup, preferred_element_type=jnp.float32)
    act = jax.nn.gelu(up, approximate=True)
    down = jnp.dot(act.astype(jnp.bfloat16), wdown, preferred_element_type=jnp.float32)
    return h1 + down


if __name__ == "__main__":
    key = jax.random.PRNGKey(0)
    ks = jax.random.split(key, 6)

    x = jax.random.normal(ks[0], (SEQ, D_MODEL), dtype=jnp.float32)
    wqkv = (0.02 * jax.random.normal(ks[1], (D_MODEL, 3 * D_MODEL), jnp.float32)).astype(jnp.bfloat16)
    wout = (0.02 * jax.random.normal(ks[2], (D_MODEL, D_MODEL), jnp.float32)).astype(jnp.bfloat16)
    wup = (0.02 * jax.random.normal(ks[3], (D_MODEL, D_FFN), jnp.float32)).astype(jnp.bfloat16)
    wdown = (0.02 * jax.random.normal(ks[4], (D_FFN, D_MODEL), jnp.float32)).astype(jnp.bfloat16)
    g1 = jnp.ones((1, D_MODEL), jnp.float32)
    b1 = jnp.zeros((1, D_MODEL), jnp.float32)
    g2 = jnp.ones((1, D_MODEL), jnp.float32)
    b2 = jnp.zeros((1, D_MODEL), jnp.float32)
    slopes = jnp.asarray(get_alibi_slopes(N_HEADS, ALIBI_BIAS_MAX)).reshape(N_HEADS, 1)

    out = mpt_block(x, wqkv, wout, wup, wdown, g1, b1, g2, b2, slopes)
    out = jax.block_until_ready(out)

    ref = mpt_block_ref(x, wqkv, wout, wup, wdown, g1, b1, g2, b2, slopes)
    assert out.shape == (SEQ, D_MODEL) and out.dtype == jnp.float32
    assert bool(jnp.allclose(out, ref, rtol=2e-3, atol=2e-3)), "mismatch vs reference"
    print("KERNEL_OK")
</pallas_src>

<mosaic_0001>
module attributes {stable_mosaic.version = 11 : i64} {
  func.func @mpt_block_kernel(%arg0: memref<16x128xf32, #tpu.memory_space<vmem>>, %arg1: memref<128x384xbf16, #tpu.memory_space<vmem>>, %arg2: memref<128x128xbf16, #tpu.memory_space<vmem>>, %arg3: memref<128x512xbf16, #tpu.memory_space<vmem>>, %arg4: memref<512x128xbf16, #tpu.memory_space<vmem>>, %arg5: memref<1x128xf32, #tpu.memory_space<vmem>>, %arg6: memref<1x128xf32, #tpu.memory_space<vmem>>, %arg7: memref<1x128xf32, #tpu.memory_space<vmem>>, %arg8: memref<1x128xf32, #tpu.memory_space<vmem>>, %arg9: memref<4x1xf32, #tpu.memory_space<vmem>>, %arg10: memref<16x128xf32, #tpu.memory_space<vmem>>) attributes {dimension_semantics = [], scalar_prefetch = 0 : i64, scratch_operands = 0 : i64, tpu.core_type = #tpu.core_type<tc>} {
    %c0 = arith.constant 0 : index
    %c0_0 = arith.constant 0 : index
    %0 = vector.load %arg0[%c0, %c0_0] : memref<16x128xf32, #tpu.memory_space<vmem>>, vector<16x128xf32>
    %c0_1 = arith.constant 0 : index
    %c0_2 = arith.constant 0 : index
    %1 = vector.load %arg5[%c0_1, %c0_2] : memref<1x128xf32, #tpu.memory_space<vmem>>, vector<1x128xf32>
    %c0_3 = arith.constant 0 : index
    %c0_4 = arith.constant 0 : index
    %2 = vector.load %arg6[%c0_3, %c0_4] : memref<1x128xf32, #tpu.memory_space<vmem>>, vector<1x128xf32>
    %cst = arith.constant dense<0.000000e+00> : vector<16xf32>
    %3 = vector.multi_reduction <add>, %0, %cst [1] : vector<16x128xf32> to vector<16xf32>
    %4 = vector.shape_cast %3 : vector<16xf32> to vector<16x1xf32>
    %cst_5 = arith.constant 1.280000e+02 : f32
    %5 = vector.broadcast %cst_5 : f32 to vector<16x1xf32>
    %6 = arith.divf %4, %5 : vector<16x1xf32>
    %7 = vector.broadcast %6 : vector<16x1xf32> to vector<16x128xf32>
    %8 = arith.subf %0, %7 : vector<16x128xf32>
    %9 = arith.mulf %8, %8 : vector<16x128xf32>
    %cst_6 = arith.constant dense<0.000000e+00> : vector<16xf32>
    %10 = vector.multi_reduction <add>, %9, %cst_6 [1] : vector<16x128xf32> to vector<16xf32>
    %11 = vector.shape_cast %10 : vector<16xf32> to vector<16x1xf32>
    %cst_7 = arith.constant 1.280000e+02 : f32
    %12 = vector.broadcast %cst_7 : f32 to vector<16x1xf32>
    %13 = arith.divf %11, %12 : vector<16x1xf32>
    %14 = vector.broadcast %6 : vector<16x1xf32> to vector<16x128xf32>
    %15 = arith.subf %0, %14 : vector<16x128xf32>
    %cst_8 = arith.constant 9.99999974E-6 : f32
    %16 = vector.broadcast %cst_8 : f32 to vector<16x1xf32>
    %17 = arith.addf %13, %16 : vector<16x1xf32>
    %18 = math.rsqrt %17 : vector<16x1xf32>
    %19 = vector.broadcast %18 : vector<16x1xf32> to vector<16x128xf32>
    %20 = arith.mulf %15, %19 : vector<16x128xf32>
    %21 = vector.broadcast %1 : vector<1x128xf32> to vector<16x128xf32>
    %22 = arith.mulf %20, %21 : vector<16x128xf32>
    %23 = vector.broadcast %2 : vector<1x128xf32> to vector<16x128xf32>
    %24 = arith.addf %22, %23 : vector<16x128xf32>
    %25 = arith.truncf %24 : vector<16x128xf32> to vector<16x128xbf16>
    %c0_9 = arith.constant 0 : index
    %c0_10 = arith.constant 0 : index
    %26 = vector.load %arg1[%c0_9, %c0_10] : memref<128x384xbf16, #tpu.memory_space<vmem>>, vector<128x384xbf16>
    %cst_11 = arith.constant dense<0.000000e+00> : vector<16x384xf32>
    %27 = tpu.matmul %25, %26, %cst_11 {dimension_numbers = #tpu.dot_dimension_numbers<[1], [0], [0], [1], [0, 0, 1, 1], [], []>} : vector<16x128xbf16>, vector<128x384xbf16>, vector<16x384xf32> -> vector<16x384xf32>
    %cst_12 = arith.constant -8.000000e+00 : f32
    %cst_13 = arith.constant 8.000000e+00 : f32
    %28 = vector.broadcast %cst_12 : f32 to vector<16x384xf32>
    %29 = arith.maximumf %28, %27 : vector<16x384xf32>
    %30 = vector.broadcast %cst_13 : f32 to vector<16x384xf32>
    %31 = arith.minimumf %30, %29 : vector<16x384xf32>
    %32 = vector.extract_strided_slice %31 {offsets = [0, 0], sizes = [16, 128], strides = [1, 1]} : vector<16x384xf32> to vector<16x128xf32>
    %33 = vector.extract_strided_slice %31 {offsets = [0, 128], sizes = [16, 128], strides = [1, 1]} : vector<16x384xf32> to vector<16x128xf32>
    %34 = vector.extract_strided_slice %31 {offsets = [0, 256], sizes = [16, 128], strides = [1, 1]} : vector<16x384xf32> to vector<16x128xf32>
    %35 = vector.extract_strided_slice %32 {offsets = [0, 0], sizes = [16, 32], strides = [1, 1]} : vector<16x128xf32> to vector<16x32xf32>
    %36 = vector.extract_strided_slice %32 {offsets = [0, 32], sizes = [16, 32], strides = [1, 1]} : vector<16x128xf32> to vector<16x32xf32>
    %37 = vector.extract_strided_slice %32 {offsets = [0, 64], sizes = [16, 32], strides = [1, 1]} : vector<16x128xf32> to vector<16x32xf32>
    %38 = vector.extract_strided_slice %32 {offsets = [0, 96], sizes = [16, 32], strides = [1, 1]} : vector<16x128xf32> to vector<16x32xf32>
    %39 = vector.shape_cast %35 : vector<16x32xf32> to vector<1x16x32xf32>
    %40 = vector.shape_cast %36 : vector<16x32xf32> to vector<1x16x32xf32>
    %41 = vector.shape_cast %37 : vector<16x32xf32> to vector<1x16x32xf32>
    %42 = vector.shape_cast %38 : vector<16x32xf32> to vector<1x16x32xf32>
    %43 = tpu.concatenate %39, %40, %41, %42 in 0 : vector<1x16x32xf32>, vector<1x16x32xf32>, vector<1x16x32xf32>, vector<1x16x32xf32> -> vector<4x16x32xf32>
    %44 = vector.extract_strided_slice %33 {offsets = [0, 0], sizes = [16, 32], strides = [1, 1]} : vector<16x128xf32> to vector<16x32xf32>
    %45 = vector.extract_strided_slice %33 {offsets = [0, 32], sizes = [16, 32], strides = [1, 1]} : vector<16x128xf32> to vector<16x32xf32>
    %46 = vector.extract_strided_slice %33 {offsets = [0, 64], sizes = [16, 32], strides = [1, 1]} : vector<16x128xf32> to vector<16x32xf32>
    %47 = vector.extract_strided_slice %33 {offsets = [0, 96], sizes = [16, 32], strides = [1, 1]} : vector<16x128xf32> to vector<16x32xf32>
    %48 = vector.shape_cast %44 : vector<16x32xf32> to vector<1x16x32xf32>
    %49 = vector.shape_cast %45 : vector<16x32xf32> to vector<1x16x32xf32>
    %50 = vector.shape_cast %46 : vector<16x32xf32> to vector<1x16x32xf32>
    %51 = vector.shape_cast %47 : vector<16x32xf32> to vector<1x16x32xf32>
    %52 = tpu.concatenate %48, %49, %50, %51 in 0 : vector<1x16x32xf32>, vector<1x16x32xf32>, vector<1x16x32xf32>, vector<1x16x32xf32> -> vector<4x16x32xf32>
    %53 = vector.extract_strided_slice %34 {offsets = [0, 0], sizes = [16, 32], strides = [1, 1]} : vector<16x128xf32> to vector<16x32xf32>
    %54 = vector.extract_strided_slice %34 {offsets = [0, 32], sizes = [16, 32], strides = [1, 1]} : vector<16x128xf32> to vector<16x32xf32>
    %55 = vector.extract_strided_slice %34 {offsets = [0, 64], sizes = [16, 32], strides = [1, 1]} : vector<16x128xf32> to vector<16x32xf32>
    %56 = vector.extract_strided_slice %34 {offsets = [0, 96], sizes = [16, 32], strides = [1, 1]} : vector<16x128xf32> to vector<16x32xf32>
    %57 = vector.shape_cast %53 : vector<16x32xf32> to vector<1x16x32xf32>
    %58 = vector.shape_cast %54 : vector<16x32xf32> to vector<1x16x32xf32>
    %59 = vector.shape_cast %55 : vector<16x32xf32> to vector<1x16x32xf32>
    %60 = vector.shape_cast %56 : vector<16x32xf32> to vector<1x16x32xf32>
    %61 = tpu.concatenate %57, %58, %59, %60 in 0 : vector<1x16x32xf32>, vector<1x16x32xf32>, vector<1x16x32xf32>, vector<1x16x32xf32> -> vector<4x16x32xf32>
    %62 = tpu.iota {dimensions = array<i32: 0>} : vector<16x16xi32>
    %63 = tpu.iota {dimensions = array<i32: 1>} : vector<16x16xi32>
    %64 = arith.cmpi sle, %63, %62 : vector<16x16xi32>
    %65 = arith.subi %63, %62 : vector<16x16xi32>
    %66 = arith.sitofp %65 : vector<16x16xi32> to vector<16x16xf32>
    %c0_14 = arith.constant 0 : index
    %c0_15 = arith.constant 0 : index
    %67 = vector.load %arg9[%c0_14, %c0_15] : memref<4x1xf32, #tpu.memory_space<vmem>>, vector<4x1xf32>
    %68 = vector.shape_cast %64 : vector<16x16xi1> to vector<1x16x16xi1>
    %69 = vector.shape_cast %67 : vector<4x1xf32> to vector<4x1x1xf32>
    %70 = vector.shape_cast %66 : vector<16x16xf32> to vector<1x16x16xf32>
    %71 = vector.broadcast %69 : vector<4x1x1xf32> to vector<4x16x16xf32>
    %72 = vector.broadcast %70 : vector<1x16x16xf32> to vector<4x16x16xf32>
    %73 = arith.mulf %71, %72 : vector<4x16x16xf32>
    %cst_16 = arith.constant -1.000000e+30 : f32
    %74 = vector.shape_cast %68 : vector<1x16x16xi1> to vector<1x16x16xi1>
    %75 = vector.broadcast %74 : vector<1x16x16xi1> to vector<4x16x16xi1>
    %76 = vector.broadcast %cst_16 : f32 to vector<4x16x16xf32>
    %77 = arith.select %75, %73, %76 : vector<4x16x16xi1>, vector<4x16x16xf32>
    "tpu.trace_start"() <{level = 10 : i32, message = "hqd,hkd->hqk"}> : () -> ()
    %cst_17 = arith.constant dense<0.000000e+00> : vector<4x16x16xf32>
    %78 = tpu.matmul %43, %52, %cst_17 {dimension_numbers = #tpu.dot_dimension_numbers<[2], [2], [1], [1], [0, 0, 0, 1, 1, 1], [0], [0]>} : vector<4x16x32xf32>, vector<4x16x32xf32>, vector<4x16x16xf32> -> vector<4x16x16xf32>
    "tpu.trace_stop"() : () -> ()
    %cst_18 = arith.constant 0.176776692 : f32
    %79 = vector.broadcast %cst_18 : f32 to vector<4x16x16xf32>
    %80 = arith.mulf %78, %79 : vector<4x16x16xf32>
    %81 = arith.addf %80, %77 : vector<4x16x16xf32>
    %cst_19 = arith.constant dense<0xFF800000> : vector<4x16xf32>
    %82 = vector.multi_reduction <maximumf>, %81, %cst_19 [2] : vector<4x16x16xf32> to vector<4x16xf32>
    %83 = vector.shape_cast %82 : vector<4x16xf32> to vector<4x16x1xf32>
    %84 = vector.broadcast %83 : vector<4x16x1xf32> to vector<4x16x16xf32>
    %85 = arith.subf %81, %84 : vector<4x16x16xf32>
    %86 = math.exp %85 : vector<4x16x16xf32>
    %cst_20 = arith.constant dense<0.000000e+00> : vector<4x16xf32>
    %87 = vector.multi_reduction <add>, %86, %cst_20 [2] : vector<4x16x16xf32> to vector<4x16xf32>
    %88 = vector.shape_cast %87 : vector<4x16xf32> to vector<4x16x1xf32>
    %89 = tpu.reciprocal %88 {approx = true} : vector<4x16x1xf32> -> vector<4x16x1xf32>
    %90 = vector.broadcast %89 : vector<4x16x1xf32> to vector<4x16x16xf32>
    %91 = arith.mulf %86, %90 : vector<4x16x16xf32>
    "tpu.trace_start"() <{level = 10 : i32, message = "hqk,hkd->hqd"}> : () -> ()
    %cst_21 = arith.constant dense<0.000000e+00> : vector<4x16x32xf32>
    %92 = tpu.matmul %91, %61, %cst_21 {dimension_numbers = #tpu.dot_dimension_numbers<[2], [1], [1], [2], [0, 0, 0, 1, 1, 2], [0], [0]>} : vector<4x16x16xf32>, vector<4x16x32xf32>, vector<4x16x32xf32> -> vector<4x16x32xf32>
    "tpu.trace_stop"() : () -> ()
    %93 = vector.extract_strided_slice %92 {offsets = [0, 0, 0], sizes = [1, 16, 32], strides = [1, 1, 1]} : vector<4x16x32xf32> to vector<1x16x32xf32>
    %94 = vector.shape_cast %93 : vector<1x16x32xf32> to vector<16x32xf32>
    %95 = vector.extract_strided_slice %92 {offsets = [1, 0, 0], sizes = [1, 16, 32], strides = [1, 1, 1]} : vector<4x16x32xf32> to vector<1x16x32xf32>
    %96 = vector.shape_cast %95 : vector<1x16x32xf32> to vector<16x32xf32>
    %97 = vector.extract_strided_slice %92 {offsets = [2, 0, 0], sizes = [1, 16, 32], strides = [1, 1, 1]} : vector<4x16x32xf32> to vector<1x16x32xf32>
    %98 = vector.shape_cast %97 : vector<1x16x32xf32> to vector<16x32xf32>
    %99 = vector.extract_strided_slice %92 {offsets = [3, 0, 0], sizes = [1, 16, 32], strides = [1, 1, 1]} : vector<4x16x32xf32> to vector<1x16x32xf32>
    %100 = vector.shape_cast %99 : vector<1x16x32xf32> to vector<16x32xf32>
    %101 = tpu.concatenate %94, %96, %98, %100 in 1 : vector<16x32xf32>, vector<16x32xf32>, vector<16x32xf32>, vector<16x32xf32> -> vector<16x128xf32>
    %102 = arith.truncf %101 : vector<16x128xf32> to vector<16x128xbf16>
    %c0_22 = arith.constant 0 : index
    %c0_23 = arith.constant 0 : index
    %103 = vector.load %arg2[%c0_22, %c0_23] : memref<128x128xbf16, #tpu.memory_space<vmem>>, vector<128x128xbf16>
    %cst_24 = arith.constant dense<0.000000e+00> : vector<16x128xf32>
    %104 = tpu.matmul %102, %103, %cst_24 {dimension_numbers = #tpu.dot_dimension_numbers<[1], [0], [0], [1], [0, 0, 1, 1], [], []>} : vector<16x128xbf16>, vector<128x128xbf16>, vector<16x128xf32> -> vector<16x128xf32>
    %105 = arith.addf %0, %104 : vector<16x128xf32>
    %c0_25 = arith.constant 0 : index
    %c0_26 = arith.constant 0 : index
    %106 = vector.load %arg7[%c0_25, %c0_26] : memref<1x128xf32, #tpu.memory_space<vmem>>, vector<1x128xf32>
    %c0_27 = arith.constant 0 : index
    %c0_28 = arith.constant 0 : index
    %107 = vector.load %arg8[%c0_27, %c0_28] : memref<1x128xf32, #tpu.memory_space<vmem>>, vector<1x128xf32>
    %cst_29 = arith.constant dense<0.000000e+00> : vector<16xf32>
    %108 = vector.multi_reduction <add>, %105, %cst_29 [1] : vector<16x128xf32> to vector<16xf32>
    %109 = vector.shape_cast %108 : vector<16xf32> to vector<16x1xf32>
    %cst_30 = arith.constant 1.280000e+02 : f32
    %110 = vector.broadcast %cst_30 : f32 to vector<16x1xf32>
    %111 = arith.divf %109, %110 : vector<16x1xf32>
    %112 = vector.broadcast %111 : vector<16x1xf32> to vector<16x128xf32>
    %113 = arith.subf %105, %112 : vector<16x128xf32>
    %114 = arith.mulf %113, %113 : vector<16x128xf32>
    %cst_31 = arith.constant dense<0.000000e+00> : vector<16xf32>
    %115 = vector.multi_reduction <add>, %114, %cst_31 [1] : vector<16x128xf32> to vector<16xf32>
    %116 = vector.shape_cast %115 : vector<16xf32> to vector<16x1xf32>
    %cst_32 = arith.constant 1.280000e+02 : f32
    %117 = vector.broadcast %cst_32 : f32 to vector<16x1xf32>
    %118 = arith.divf %116, %117 : vector<16x1xf32>
    %119 = vector.broadcast %111 : vector<16x1xf32> to vector<16x128xf32>
    %120 = arith.subf %105, %119 : vector<16x128xf32>
    %cst_33 = arith.constant 9.99999974E-6 : f32
    %121 = vector.broadcast %cst_33 : f32 to vector<16x1xf32>
    %122 = arith.addf %118, %121 : vector<16x1xf32>
    %123 = math.rsqrt %122 : vector<16x1xf32>
    %124 = vector.broadcast %123 : vector<16x1xf32> to vector<16x128xf32>
    %125 = arith.mulf %120, %124 : vector<16x128xf32>
    %126 = vector.broadcast %106 : vector<1x128xf32> to vector<16x128xf32>
    %127 = arith.mulf %125, %126 : vector<16x128xf32>
    %128 = vector.broadcast %107 : vector<1x128xf32> to vector<16x128xf32>
    %129 = arith.addf %127, %128 : vector<16x128xf32>
    %130 = arith.truncf %129 : vector<16x128xf32> to vector<16x128xbf16>
    %c0_34 = arith.constant 0 : index
    %c0_35 = arith.constant 0 : index
    %131 = vector.load %arg3[%c0_34, %c0_35] : memref<128x512xbf16, #tpu.memory_space<vmem>>, vector<128x512xbf16>
    %cst_36 = arith.constant dense<0.000000e+00> : vector<16x512xf32>
    %132 = tpu.matmul %130, %131, %cst_36 {dimension_numbers = #tpu.dot_dimension_numbers<[1], [0], [0], [1], [0, 0, 1, 1], [], []>} : vector<16x128xbf16>, vector<128x512xbf16>, vector<16x512xf32> -> vector<16x512xf32>
    %133 = arith.mulf %132, %132 : vector<16x512xf32>
    %134 = arith.mulf %132, %133 : vector<16x512xf32>
    %cst_37 = arith.constant 4.471500e-02 : f32
    %135 = vector.broadcast %cst_37 : f32 to vector<16x512xf32>
    %136 = arith.mulf %135, %134 : vector<16x512xf32>
    %137 = arith.addf %132, %136 : vector<16x512xf32>
    %cst_38 = arith.constant 0.797884583 : f32
    %138 = vector.broadcast %cst_38 : f32 to vector<16x512xf32>
    %139 = arith.mulf %138, %137 : vector<16x512xf32>
    %140 = math.tanh %139 : vector<16x512xf32>
    %cst_39 = arith.constant 1.000000e+00 : f32
    %141 = vector.broadcast %cst_39 : f32 to vector<16x512xf32>
    %142 = arith.addf %141, %140 : vector<16x512xf32>
    %cst_40 = arith.constant 5.000000e-01 : f32
    %143 = vector.broadcast %cst_40 : f32 to vector<16x512xf32>
    %144 = arith.mulf %143, %142 : vector<16x512xf32>
    %145 = arith.mulf %132, %144 : vector<16x512xf32>
    %146 = arith.truncf %145 : vector<16x512xf32> to vector<16x512xbf16>
    %c0_41 = arith.constant 0 : index
    %c0_42 = arith.constant 0 : index
    %147 = vector.load %arg4[%c0_41, %c0_42] : memref<512x128xbf16, #tpu.memory_space<vmem>>, vector<512x128xbf16>
    %cst_43 = arith.constant dense<0.000000e+00> : vector<16x128xf32>
    %148 = tpu.matmul %146, %147, %cst_43 {dimension_numbers = #tpu.dot_dimension_numbers<[1], [0], [0], [1], [0, 0, 1, 1], [], []>} : vector<16x512xbf16>, vector<512x128xbf16>, vector<16x128xf32> -> vector<16x128xf32>
    %149 = arith.addf %105, %148 : vector<16x128xf32>
    %c0_44 = arith.constant 0 : index
    %c0_45 = arith.constant 0 : index
    %150 = vector.load %arg10[%c0_44, %c0_45] : memref<16x128xf32, #tpu.memory_space<vmem>>, vector<16x128xf32>
    tpu.vector_store %arg10[%c0_44, %c0_45], %149 {strides = array<i32>} : memref<16x128xf32, #tpu.memory_space<vmem>>, vector<16x128xf32>,
    return
  }
}

</mosaic_0001>

<bundles_post_ra>
// kernel: mpt_block.1
= control target key start
LH: loop header
LB: loop body
LE: loop exit
PB: predicated region body
PF: predicated region fallthrough
CT: control target
= control target key end

     0   :  { %15 = vsyncpa [#allocation3], 0  ;;  %s3348_s0 = inlined_call_operand.hbm [shape: f32[16,128], index: 0, kind: input, shape index: {}]   ;;  %s3349_s1 = inlined_call_operand.hbm [shape: bf16[128,384], index: 1, kind: input, shape index: {}]   ;;  %s3350_s2 = inlined_call_operand.hbm [shape: bf16[128,128], index: 2, kind: input, shape index: {}]   ;;  %s3351_s3 = inlined_call_operand.hbm [shape: bf16[128,512], index: 3, kind: input, shape index: {}]   ;;  %s3352_s4 = inlined_call_operand.hbm [shape: bf16[512,128], index: 4, kind: input, shape index: {}]   ;;  %s3353_s5 = inlined_call_operand.vmem [shape: f32[1,128], index: 5, kind: input, shape index: {}]   ;;  %s3354_s6 = inlined_call_operand.vmem [shape: f32[1,128], index: 6, kind: input, shape index: {}]   ;;  %s3355_s7 = inlined_call_operand.vmem [shape: f32[1,128], index: 7, kind: input, shape index: {}]   ;;  %s3356_s8 = inlined_call_operand.vmem [shape: f32[1,128], index: 8, kind: input, shape index: {}]   ;;  %s3357_s9 = inlined_call_operand.vmem [shape: f32[4,1], index: 9, kind: input, shape index: {}]   ;;  %s3358_s10 = inlined_call_operand.hbm [shape: f32[16,128], index: 10, kind: output, shape index: {}]  }
   0x1   :  { %16 = vsyncpa [#allocation6], 0 }
   0x2   :  { %17 = vsyncpa [#allocation9], 0 }
   0x3   :  { %18 = vsyncpa [#allocation4], 0  ;;  %s2946_s13 = smov [#allocation5]   ;;  %s2806_s17 = scalar_lea.hbm %s3349_s1, 3072 }
   0x4   :  { %s36_s14 = sshll.u32 %s2946_s13, 4  ;;  %p2807_p0 = scmp.ne.s32.totalorder %s3349_s1, %s2806_s17  ;;  %s37_s14 = int_to_ptr.vmem [resolvable:$true] %s36_s14 }
   0x5   :  { %p2810_p1 = scmp.lt.u32.totalorder %s2806_s17, %s3349_s1 }
   0x7   :  { %p2812_p2 = pnand %p2810_p1, %p2807_p0 }
   0x9   :  { %2815 = shalt.err (!%p2812_p2)
}
   0xa   :  { %s2816_s22 = scalar_lea.vmem %s37_s14, 3072  ;;  %p2821_p4 = scmp.lt.s32.totalorder %s37_s14, %s37_s14 }
   0xb   :  { %p2817_p3 = scmp.ne.s32.totalorder %s37_s14, %s2816_s22  ;;  %p2822_p5 = scmp.lt.s32.totalorder %s2816_s22, %s2816_s22 }
   0xd   :  { %p2823_p6 = por %p2822_p5, %p2821_p4 }
   0xf   :  { %p2824_p7 = pnand %p2823_p6, %p2817_p3 }
  0x11   :  { %2827 = shalt.err (!%p2824_p7)
}
  0x12   :  { %s2947_s23 = smov 192   ;;  %s2948_s24 = smov 12  }
  0x13   :  { %42 = dma.hbm_to_vmem [thread:$0]  %s3349_s1, 3072, %s37_s14, [#allocation6], %s2947_s23, %s2947_s23, %s2948_s24  }
  0x14   :  { %s2949_s27 = smov [#allocation8]   ;;  %s2828_s11 = scalar_lea.hbm %s3351_s3, 4096 }
  0x15   :  { %s60_s28 = sshll.u32 %s2949_s27, 4  ;;  %p2829_p8 = scmp.ne.s32.totalorder %s3351_s3, %s2828_s11  ;;  %s61_s28 = int_to_ptr.vmem [resolvable:$true] %s60_s28 }
  0x16   :  { %p2832_p9 = scmp.lt.u32.totalorder %s2828_s11, %s3351_s3 }
  0x18   :  { %p2834_p10 = pnand %p2832_p9, %p2829_p8 }
  0x1a   :  { %2837 = shalt.err (!%p2834_p10)
}
  0x1b   :  { %s2838_s17 = scalar_lea.vmem %s61_s28, 4096  ;;  %p2843_p12 = scmp.lt.s32.totalorder %s61_s28, %s61_s28 }
  0x1c   :  { %p2839_p11 = scmp.ne.s32.totalorder %s61_s28, %s2838_s17  ;;  %p2844_p13 = scmp.lt.s32.totalorder %s2838_s17, %s2838_s17 }
  0x1e   :  { %p2845_p0 = por %p2844_p13, %p2843_p12 }
  0x20   :  { %p2846_p1 = pnand %p2845_p0, %p2839_p11 }
  0x22   :  { %2849 = shalt.err (!%p2846_p1)
}
  0x23   :  { %s2950_s1 = smov 256   ;;  %s2951_s14 = smov 16  }
  0x24   :  { %66 = dma.hbm_to_vmem [thread:$0]  %s3351_s3, 4096, %s61_s28, [#allocation9], %s2950_s1, %s2950_s1, %s2951_s14  }
  0x25   :  { %s2952_s20 = smov [#allocation2]   ;;  %s2850_s24 = scalar_lea.hbm %s3348_s0, 256 }
  0x26   :  { %s24_s21 = sshll.u32 %s2952_s20, 4  ;;  %p2851_p2 = scmp.ne.s32.totalorder %s3348_s0, %s2850_s24  ;;  %s25_s21 = int_to_ptr.vmem [resolvable:$true] %s24_s21 }
  0x27   :  { %p2854_p3 = scmp.lt.u32.totalorder %s2850_s24, %s3348_s0 }
  0x29   :  { %p2856_p4 = pnand %p2854_p3, %p2851_p2 }
  0x2b   :  { %2859 = shalt.err (!%p2856_p4)
}
  0x2c   :  { %s2860_s30 = scalar_lea.vmem %s25_s21, 256  ;;  %p2865_p6 = scmp.lt.s32.totalorder %s25_s21, %s25_s21 }
  0x2d   :  { %p2861_p5 = scmp.ne.s32.totalorder %s25_s21, %s2860_s30  ;;  %p2866_p7 = scmp.lt.s32.totalorder %s2860_s30, %s2860_s30 }
  0x2f   :  { %p2867_p8 = por %p2866_p7, %p2865_p6 }
  0x31   :  { %p2868_p9 = pnand %p2867_p8, %p2861_p5 }
  0x33   :  { %2871 = shalt.err (!%p2868_p9)
}
  0x34   :  { %s2953_s3 = smov 128   ;;  %s2954_s28 = smov 8  }
  0x35   :  { %30 = dma.hbm_to_vmem [thread:$0]  %s3348_s0, 256, %s25_s21, [#allocation3], %s2953_s3, %s2953_s3, %s2954_s28  }
  0x36   :  { %s2955_s13 = smov [#allocation7]   ;;  %s2872_s1 = scalar_lea.hbm %s3350_s2, 1024 }
  0x37   :  { %s48_s15 = sshll.u32 %s2955_s13, 4  ;;  %p2873_p10 = scmp.ne.s32.totalorder %s3350_s2, %s2872_s1  ;;  %s49_s15 = int_to_ptr.vmem [resolvable:$true] %s48_s15 }
  0x38   :  { %p2876_p11 = scmp.lt.u32.totalorder %s2872_s1, %s3350_s2 }
  0x3a   :  { %p2878_p12 = pnand %p2876_p11, %p2873_p10 }
  0x3c   :  { %2881 = shalt.err (!%p2878_p12)
}
  0x3d   :  { %s2882_s22 = scalar_lea.vmem %s49_s15, 1024  ;;  %p2887_p0 = scmp.lt.s32.totalorder %s49_s15, %s49_s15 }
  0x3e   :  { %p2883_p13 = scmp.ne.s32.totalorder %s49_s15, %s2882_s22  ;;  %p2888_p1 = scmp.lt.s32.totalorder %s2882_s22, %s2882_s22 }
  0x40   :  { %p2889_p2 = por %p2888_p1, %p2887_p0 }
  0x42   :  { %p2890_p3 = pnand %p2889_p2, %p2883_p13 }
  0x44   :  { %2893 = shalt.err (!%p2890_p3)
}
  0x45   :  { %s2956_s0 = smov 64   ;;  %s2957_s21 = smov 4  }
  0x46   :  { %54 = dma.hbm_to_vmem [thread:$0]  %s3350_s2, 1024, %s49_s15, [#allocation6], %s2956_s0, %s2956_s0, %s2957_s21  }
  0x47   :  { %s2958_s25 = smov [#allocation10]   ;;  %s2894_s30 = scalar_lea.hbm %s3352_s4, 4096 }
  0x48   :  { %s72_s26 = sshll.u32 %s2958_s25, 4  ;;  %p2895_p4 = scmp.ne.s32.totalorder %s3352_s4, %s2894_s30  ;;  %s73_s26 = int_to_ptr.vmem [resolvable:$true] %s72_s26 }
  0x49   :  { %p2898_p5 = scmp.lt.u32.totalorder %s2894_s30, %s3352_s4 }
  0x4b   :  { %p2900_p6 = pnand %p2898_p5, %p2895_p4 }
  0x4d   :  { %2903 = shalt.err (!%p2900_p6)
}
  0x4e   :  { %s2904_s17 = scalar_lea.vmem %s73_s26, 4096  ;;  %p2909_p8 = scmp.lt.s32.totalorder %s73_s26, %s73_s26 }
  0x4f   :  { %p2905_p7 = scmp.ne.s32.totalorder %s73_s26, %s2904_s17  ;;  %p2910_p9 = scmp.lt.s32.totalorder %s2904_s17, %s2904_s17 }
  0x51   :  { %p2911_p10 = por %p2910_p9, %p2909_p8 }
  0x53   :  { %p2912_p11 = pnand %p2911_p10, %p2905_p7 }
  0x55   :  { %2915 = shalt.err (!%p2912_p11)
}
  0x56   :  { %78 = dma.hbm_to_vmem [thread:$0]  %s3352_s4, 4096, %s73_s26, [#allocation9], %s2956_s0, %s2956_s0, %s2957_s21  }
  0x57   :  { %2938 = dma.done.wait [#allocation3], 256  }
  0x58   :  { %2939 = vsyncadd [#allocation3], 4294967040 }
  0x59   :  { %2940 = dma.done.wait [#allocation6], 4096  }
  0x5a   :  { %2941 = vsyncadd [#allocation6], 4294963200 }
  0x5b   :  { %2942 = dma.done.wait [#allocation9], 8192  }
  0x5c   :  { %2943 = vsyncadd [#allocation9], 4294959104  ;;  %v105_v0 = vld [vmem:[#allocation2] sm:$0xff]  ;;  %v106_v1 = vld [vmem:[#allocation2 + $0x8] sm:$0xff]  ;;  %v2959_v4 = vmov 0.0   ;;  %v2960_v30 = vmov 0  }
  0x5d   :  { %109 = vadd.xlane.f32.xlu0 %v105_v0  ;;  %v2628_v2 = vld [vmem:[#allocation5 + $0x4] ss:$12 sps:$4 sm:$0xff]   ;;  %v2630_v3 = vld [vmem:[#allocation5] ss:$12 sps:$4 sm:$0xff]   ;;  %2425 = vmatprep.subr.bf16.mxu1 %v2959_v4  ;;  %v2631_v5 = vld [vmem:[#allocation5 + $0x8] ss:$12 sps:$4 sm:$0xff]  }
  0x5e   :  { %v2632_v6 = vld [vmem:[#allocation5 + $0x1c] ss:$12 sps:$4 sm:$0xff]   ;;  %309 = vmatprep.subr.bf16.mxu0 %v2628_v2  ;;  %2426 = vmatpush3.bf16.msra.mxu1 %v2631_v5  ;;  %v2634_v15 = vld [vmem:[#allocation5 + $0x18] ss:$12 sps:$4 sm:$0xff]   ;;  %v2635_v16 = vld [vmem:[#allocation5 + $0x20] ss:$12 sps:$4 sm:$0xff]   ;;  %v453_v2 = vlaneseq }
  0x5f   :  { %310 = vmatpush1.bf16.msra.mxu0 %v2630_v3  ;;  %2427 = vmatprep.subr.bf16.mxu1 %v2959_v4  ;;  %v2636_v17 = vld [vmem:[#allocation5 + $0x34] ss:$12 sps:$4 sm:$0xff]   ;;  %v2638_v18 = vld [vmem:[#allocation5 + $0x30] ss:$12 sps:$4 sm:$0xff]   ;;  %v2639_v19 = vld [vmem:[#allocation5 + $0x38] ss:$12 sps:$4 sm:$0xff]  }
  0x60   :  { %311 = vmatprep.subr.bf16.mxu0 %v2632_v6  ;;  %v2640_v20 = vld [vmem:[#allocation5 + $0x4c] ss:$12 sps:$4 sm:$0xff]   ;;  %v2642_v21 = vld [vmem:[#allocation5 + $0x48] ss:$12 sps:$4 sm:$0xff]   ;;  %v2643_v22 = vld [vmem:[#allocation5 + $0x50] ss:$12 sps:$4 sm:$0xff]   ;;  %341 = vmatprep.mubr.bf16.mxu0 %v2960_v30 }
  0x61   :  { %111 = vadd.xlane.f32.xlu0 %v106_v1  ;;  %v2644_v23 = vld [vmem:[#allocation5 + $0x64] ss:$12 sps:$4 sm:$0xff]   ;;  %v2646_v24 = vld [vmem:[#allocation5 + $0x60] ss:$12 sps:$4 sm:$0xff]   ;;  %v2647_v25 = vld [vmem:[#allocation5 + $0x68] ss:$12 sps:$4 sm:$0xff]   ;;  %2596 = vset.pattern.permute.xlu1 %v2960_v30 }
  0x62   :  { %2428 = vmatpush3.bf16.msra.mxu1 %v2635_v16  ;;  %v2648_v26 = vld [vmem:[#allocation5 + $0x7c] ss:$12 sps:$4 sm:$0xff]   ;;  %v2650_v27 = vld [vmem:[#allocation5 + $0x78] ss:$12 sps:$4 sm:$0xff]   ;;  %v2651_v28 = vld [vmem:[#allocation5 + $0x80] ss:$12 sps:$4 sm:$0xff]   ;;  %2597 = vset.pattern.permute.xlu0 %v2960_v30 }
  0x63   :  { %312 = vmatpush1.bf16.msra.mxu0 %v2634_v15  ;;  %2429 = vmatprep.subr.bf16.mxu1 %v2959_v4  ;;  %v2652_v29 = vld [vmem:[#allocation5 + $0x94] ss:$12 sps:$4 sm:$0xff]   ;;  %vm2961_vm0 = vmmov 0   ;;  %v2654_v31 = vld [vmem:[#allocation5 + $0x90] ss:$12 sps:$4 sm:$0xff]   ;;  %vm542_vm1 = vcmask 261120  }
  0x64   :  { %313 = vmatprep.subr.bf16.mxu0 %v2636_v17  ;;  %2441 = vmatprep.mubr.msk.bf16.mxu1 %vm2961_vm0, %v2959_v4  ;;  %v2655_v32 = vld [vmem:[#allocation5 + $0x98] ss:$12 sps:$4 sm:$0xff]   ;;  %v2658_v34 = vld [vmem:[#allocation5 + $0xa8] ss:$12 sps:$4 sm:$0xff]   ;;  %v2659_v35 = vld [vmem:[#allocation5 + $0xb0] ss:$12 sps:$4 sm:$0xff]  }
  0x65   :  { %v2656_v33 = vld [vmem:[#allocation5 + $0xac] ss:$12 sps:$4 sm:$0xff]   ;;  %v2200_v44 = vld [vmem:[%s3353_s5] ss:$0 sm:$0xff]  ;;  %s2962_s5 = smov 96   ;;  %vm3123_vm2 = vmpackc.low %vm542_vm1, %vm542_vm1  ;;  %vm891_vm5 = vcmask 130048  }
  0x66   :  { %2430 = vmatpush3.bf16.msra.mxu1 %v2639_v19  ;;  %v2201_v48 = vld [vmem:[%s3354_s6] ss:$0 sm:$0xff]  ;;  %v2963_v3 = vmov 1966171168   ;;  %s2964_s6 = smov 32   ;;  %vm1330_vm6 = vcmask 523264  }
  0x67   :  { %314 = vmatpush1.bf16.msra.mxu0 %v2638_v18  ;;  %2431 = vmatprep.subr.bf16.mxu1 %v2959_v4  ;;  %v475_v5 = vunpack.c.l.s4 %v2963_v3  ;;  %v2232_v15 = vld.sshfl [vmem:[%s3357_s9] sm:$0x33 pattern:$0x75316420]  ;;  %vm1333_vm7 = vcmask 785408  }
  0x68   :  { %315 = vmatprep.subr.bf16.mxu0 %v2640_v20  ;;  %v473_v18 = vcombine.high %v2232_v15, %v2232_v15 }
  0x6a   :  { %2432 = vmatpush3.bf16.msra.mxu1 %v2643_v22 }
  0x6b   :  { %316 = vmatpush1.bf16.msra.mxu0 %v2642_v21  ;;  %2433 = vmatprep.subr.bf16.mxu1 %v2959_v4 }
  0x6c   :  { %317 = vmatprep.subr.bf16.mxu0 %v2644_v23 }
  0x6e   :  { %2434 = vmatpush3.bf16.msra.mxu1 %v2647_v25 }
  0x6f   :  { %318 = vmatpush1.bf16.msra.mxu0 %v2646_v24  ;;  %2435 = vmatprep.subr.bf16.mxu1 %v2959_v4 }
  0x70   :  { %319 = vmatprep.subr.bf16.mxu0 %v2648_v26 }
  0x72   :  { %2436 = vmatpush3.bf16.msra.mxu1 %v2651_v28 }
  0x73   :  { %320 = vmatpush1.bf16.msra.mxu0 %v2650_v27  ;;  %2437 = vmatprep.subr.bf16.mxu1 %v2959_v4 }
  0x74   :  { %321 = vmatprep.subr.bf16.mxu0 %v2652_v29 }
  0x76   :  { %2438 = vmatpush3.bf16.msra.mxu1 %v2655_v32 }
  0x77   :  { %322 = vmatpush1.bf16.msra.mxu0 %v2654_v31  ;;  %2439 = vmatprep.subr.bf16.mxu1 %v2959_v4 }
  0x78   :  { %323 = vmatprep.subr.bf16.mxu0 %v2656_v33 }
  0x7a   :  { %2440 = vmatpush3.bf16.msra.mxu1 %v2659_v35 }
  0x7b   :  { %324 = vmatpush1.bf16.msra.mxu0 %v2658_v34 }
  0xea   :  { %v110_v7 = vpop.xlane.xlu0 %109 }
  0xeb   :  { %v114_v8 = vmul.f32 0.0078125, %v110_v7 }
  0xed   :  { %v3090_v9 = vsub.f32 %v105_v0, %v114_v8 }
  0xee   :  { %v112_v10 = vpop.xlane.xlu0 %111 }
  0xef   :  { %v115_v11 = vmul.f32 0.0078125, %v112_v10  ;;  %v118_v12 = vmul.f32 %v3090_v9, %v3090_v9 }
  0xf1   :  { %v3094_v13 = vsub.f32 %v106_v1, %v115_v11  ;;  %120 = vadd.xlane.f32.xlu1 %v118_v12  ;;  %v3129_v11 = vshrl.u32 %v453_v2, 7  ;;  %v476_v12 = vunpack.c.0.s8 %v475_v5 }
  0xf3   :  { %v119_v14 = vmul.f32 %v3094_v13, %v3094_v13  ;;  %v492_v17 = vsub.s32 0, %v3129_v11 }
  0xf5   :  { %122 = vadd.xlane.f32.xlu1 %v119_v14  ;;  %v479_v14 = vsub.s32 %v476_v12, %v3129_v11 }
  0xf7   :  { %v480_v16 = vrot.slane %v2232_v15, %v479_v14  ;;  %v487_v21 = vrot.slane %v473_v18, %v479_v14 }
  0xf9   :  { %v493_v19 = vrot.slane %v480_v16, %v492_v17  ;;  %v488_v20 = vcombine.high %v480_v16, %v480_v16  ;;  %v489_v23 = vcombine.high %v487_v21, %v487_v21  ;;  %v497_v24 = vrot.slane %v487_v21, %v492_v17 }
  0xfb   :  { %v501_v22 = vrot.slane %v488_v20, %v492_v17  ;;  %v505_v25 = vrot.slane %v489_v23, %v492_v17 }
 0x17e   :  { %v121_v36 = vpop.xlane.xlu1 %120 }
 0x17f   :  { %v124_v37 = vmul.f32 0.0078125, %v121_v36 }
 0x181   :  { %v126_v38 = vadd.f32 1e-05, %v124_v37 }
 0x182   :  { %v123_v39 = vpop.xlane.xlu1 %122 }
 0x183   :  { %2748 = vrsqrt.f32 %v126_v38  ;;  %v125_v40 = vmul.f32 0.0078125, %v123_v39 }
 0x185   :  { %v127_v41 = vadd.f32 1e-05, %v125_v40 }
 0x187   :  { %2750 = vrsqrt.f32 %v127_v41 }
 0x18d   :  { %v2749_v42 = vpop.eup %2748 }
 0x18e   :  { %v130_v43 = vmul.f32 %v2749_v42, %v3090_v9 }
 0x190   :  { %v138_v47 = vmul.f32 %v2200_v44, %v130_v43 }
 0x191   :  { %v2751_v45 = vpop.eup %2750 }
 0x192   :  { %v131_v46 = vmul.f32 %v2751_v45, %v3094_v13  ;;  %v146_v50 = vadd.f32 %v2201_v48, %v138_v47  ;;  %v455_v45 = vadd.s32 8, %v3129_v11 }
 0x194   :  { %v139_v49 = vmul.f32 %v2200_v44, %v131_v46  ;;  %v3168_v46 = vand.u32 127, %v453_v2 }
 0x196   :  { %v147_v51 = vadd.f32 %v2201_v48, %v139_v49  ;;  %v461_v47 = vsub.s32 %v3168_v46, %v455_v45  ;;  %v460_v48 = vsub.s32 %v3168_v46, %v3129_v11  ;;  %vm459_vm3 = vcmp.le.s32.totalorder %v3168_v46, %v455_v45 }
 0x197   :  { %vm458_vm4 = vcmp.le.s32.totalorder %v3168_v46, %v3129_v11 }
 0x198   :  { %v148_v52 = vpack.c.bf16 %v147_v51, %v146_v50  ;;  %v463_v49 = vcvt.s32.f32 %v461_v47  ;;  %v462_v50 = vcvt.s32.f32 %v460_v48 }
 0x19a   :  { %342 = vmatmul.mubr.bf16.vlgmr.msra.gmra.mrb[0].mxu0 %v148_v52  ;;  %2442 = vmatmul.mubr.bf16.vlgmr.msra.gmra.mrb[0].mxu1 %v148_v52 }
 0x26d   :  { %v343_v53 = vpop.f32.mrb[0].mxu0  ;;  %v386_v54 = vpop.f32.mrb[0].mxu1 }
 0x26e   :  { %v2226_v55 = vclamps-f32 %v343_v53, 8.0  ;;  %v345_v56 = vpop.f32.mrb[1].mxu0  ;;  %v2443_v57 = vpop.f32.mrb[1].mxu1  ;;  %v2228_v60 = vclamps-f32 %v386_v54, 8.0 }
 0x26f   :  { %v347_v58 = vpop.f32.mrb[2].mxu0  ;;  %v389_v59 = vpop.f32.mrb[2].mxu1  ;;  %v2227_v0 = vclamps-f32 %v345_v56, 8.0 }
 0x270   :  { %v2231_v61 = vclamps-f32 %v389_v59, 8.0  ;;  %v2444_v62 = vpop.f32.mrb[3].mxu1  ;;  %407 = vrot.lane.b32.xlu1 %v2226_v55, %s2962_s5  ;;  %v349_v63 = vpop.f32.mrb[3].mxu0  ;;  %2449 = vmatprep.mubr.msk.f32.mxu1 %vm542_vm1, %v2226_v55  ;;  %v2229_v13 = vclamps-f32 %v347_v58, 8.0 }
 0x271   :  { %v2230_v1 = vclamps-f32 %v349_v63, 8.0 }
 0x272   :  { %v2545_v6 = vpack.c.bf16 %v2231_v61, %v2228_v60  ;;  %v3119_v7 = vpack.i.bf16 %v2231_v61, %v2228_v60 }
 0x273   :  { %v2586_v8 = vpack.i.bf16 %v2230_v1, %v2227_v0  ;;  %v2521_v9 = vpack.c.bf16 %v2230_v1, %v2227_v0 }
 0x274   :  { %2546 = vmatprep.subr.bf16.mxu0 %v2545_v6 }
 0x275   :  { %2548 = vmatpush3.bf16.msra.mxu0 %v2545_v6  ;;  %2587 = vrot.lane.b32.xlu1 %v2586_v8, %s2956_s0 }
 0x276   :  { %2582 = vrot.lane.b32.xlu0 %v2586_v8, %s2962_s5  ;;  %2523 = vmatprep.subr.msk.bf16.mxu1 %vm3123_vm2, %v2521_v9 }
 0x277   :  { %2526 = vmatpush3.bf16.xpose.msk.msra.mxu1 %vm3123_vm2, %v2521_v9 }
 0x279   :  { %409 = vrot.lane.b32.xlu1 %v2229_v13, %s2962_s5 }
 0x27a   :  { %2592 = vrot.lane.b32.xlu0 %v2586_v8, %s2964_s6 }
 0x27d   :  { %411 = vrot.lane.b32.xlu1 %v2226_v55, %s2956_s0 }
 0x27e   :  { %413 = vrot.lane.b32.xlu0 %v2229_v13, %s2956_s0  ;;  %2450 = vmatmul.mubr.msk.f32.vlgmr.msra.gmra.mrb[4].mxu1 %vm542_vm1, %v2229_v13 }
 0x281   :  { %415 = vrot.lane.b32.xlu1 %v2226_v55, %s2964_s6 }
 0x282   :  { %417 = vrot.lane.b32.xlu0 %v2229_v13, %s2964_s6 }
 0x285   :  { %507 = vperm.xlu1 %2596, %v493_v19  }
 0x286   :  { %511 = vperm.xlu0 %2597, %v497_v24  }
 0x289   :  { %515 = vperm.xlu1 %2596, %v501_v22  }
 0x28d   :  { %519 = vperm.xlu1 %2596, %v505_v25  }
 0x2e2   :  { %v408_v26 = vpop.permute.xlu1 %407 }
 0x2e3   :  { %2456 = vmatprep.mubr.msk.f32.mxu1 %vm542_vm1, %v408_v26 }
 0x2e7   :  { %v2588_v27 = vpop.permute.xlu1 %2587 }
 0x2e8   :  { %v2583_v28 = vpop.permute.xlu0 %2582  ;;  %v2590_v29 = vunpack.i.h.bf16 %v2588_v27  ;;  %v2589_v31 = vunpack.i.l.bf16 %v2588_v27 }
 0x2e9   :  { %v2585_v32 = vunpack.i.h.bf16 %v2583_v28  ;;  %v2584_v33 = vunpack.i.l.bf16 %v2583_v28 }
 0x2ea   :  { %v2533_v35 = vpack.c.bf16 %v2590_v29, %v2589_v31 }
 0x2eb   :  { %v2527_v34 = vpack.c.bf16 %v2585_v32, %v2584_v33  ;;  %v410_v37 = vpop.permute.xlu1 %409 }
 0x2ec   :  { %v2593_v36 = vpop.permute.xlu0 %2592 }
 0x2ed   :  { %2529 = vmatprep.subr.msk.bf16.mxu1 %vm3123_vm2, %v2527_v34  ;;  %v2595_v38 = vunpack.i.h.bf16 %v2593_v36  ;;  %v2594_v39 = vunpack.i.l.bf16 %v2593_v36 }
 0x2ee   :  { %2532 = vmatpush3.bf16.xpose.msk.msra.mxu1 %vm3123_vm2, %v2527_v34 }
 0x2ef   :  { %2535 = vmatprep.subr.msk.bf16.mxu1 %vm3123_vm2, %v2533_v35  ;;  %v2539_v40 = vpack.c.bf16 %v2595_v38, %v2594_v39  ;;  %v412_v41 = vpop.permute.xlu1 %411 }
 0x2f0   :  { %v414_v42 = vpop.permute.xlu0 %413 }
 0x2f3   :  { %v416_v43 = vpop.permute.xlu1 %415 }
 0x2f4   :  { %v418_v44 = vpop.permute.xlu0 %417 }
 0x2f5   :  { %2457 = vmatmul.mubr.msk.f32.vlgmr.msra.gmra.mrb[6].mxu1 %vm542_vm1, %v410_v37 }
 0x2f6   :  { %2538 = vmatpush3.bf16.xpose.msk.msra.mxu1 %vm3123_vm2, %v2533_v35  ;;  %2463 = vmatprep.mubr.msk.f32.mxu1 %vm542_vm1, %v412_v41 }
 0x2f7   :  { %2541 = vmatprep.subr.msk.bf16.mxu1 %vm3123_vm2, %v2539_v40 }
 0x2fd   :  { %2464 = vmatmul.mubr.msk.f32.vlgmr.msra.gmra.mrb[8].mxu1 %vm542_vm1, %v414_v42 }
 0x2fe   :  { %2544 = vmatpush3.bf16.xpose.msk.msra.mxu1 %vm3123_vm2, %v2539_v40  ;;  %2470 = vmatprep.mubr.msk.f32.mxu1 %vm542_vm1, %v416_v43 }
 0x304   :  { %v508_v51 = vpop.permute.xlu1 %507 }
 0x305   :  { %2471 = vmatmul.mubr.msk.f32.vlgmr.msra.gmra.mrb[10].mxu1 %vm542_vm1, %v418_v44  ;;  %v523_v52 = vmul.f32 %v508_v51, %v463_v49  ;;  %v522_v53 = vmul.f32 %v508_v51, %v462_v50  ;;  %v512_v0 = vpop.permute.xlu0 %511 }
 0x306   :  { %v525_v1 = vmul.f32 %v512_v0, %v463_v49  ;;  %v524_v2 = vmul.f32 %v512_v0, %v462_v50 }
 0x307   :  { %v535_v55 = vsel %vm459_vm3, %v523_v52, -1e+30  ;;  %v534_v58 = vsel %vm458_vm4, %v522_v53, -1e+30 }
 0x308   :  { %v537_v5 = vsel %vm459_vm3, %v525_v1, -1e+30  ;;  %v536_v9 = vsel %vm458_vm4, %v524_v2, -1e+30  ;;  %v516_v14 = vpop.permute.xlu1 %515 }
 0x309   :  { %v527_v16 = vmul.f32 %v516_v14, %v463_v49  ;;  %v526_v17 = vmul.f32 %v516_v14, %v462_v50 }
 0x30b   :  { %v539_v23 = vsel %vm459_vm3, %v527_v16, -1e+30  ;;  %v538_v26 = vsel %vm458_vm4, %v526_v17, -1e+30 }
 0x30c   :  { %v520_v24 = vpop.permute.xlu1 %519 }
 0x30d   :  { %v529_v29 = vmul.f32 %v520_v24, %v463_v49  ;;  %v528_v32 = vmul.f32 %v520_v24, %v462_v50 }
 0x30f   :  { %v541_v37 = vsel %vm459_vm3, %v529_v29, -1e+30  ;;  %v540_v39 = vsel %vm458_vm4, %v528_v32, -1e+30 }
 0x351   :  { %v2451_v54 = vpop.f32.mrb[4].mxu1 }
 0x352   :  { %v876_v56 = vmul.f32 0.17677669, %v2451_v54  ;;  %v617_v57 = vpop.f32.mrb[5].mxu1 }
 0x353   :  { %v875_v59 = vmul.f32 0.17677669, %v617_v57 }
 0x354   :  { %v884_v60 = vadd.f32 %v876_v56, %v535_v55 }
 0x355   :  { %v883_v61 = vadd.f32 %v875_v59, %v534_v58 }
 0x356   :  { %v895_v62 = vsel %vm891_vm5, %v884_v60, -inf }
 0x357   :  { %896 = vmax.xlane.f32.xlu1 %v895_v62  ;;  %v892_v63 = vsel %vm891_vm5, %v883_v61, -inf }
 0x358   :  { %893 = vmax.xlane.f32.xlu0 %v892_v63 }
 0x3c8   :  { %v2458_v3 = vpop.f32.mrb[6].mxu1 }
 0x3c9   :  { %v878_v6 = vmul.f32 0.17677669, %v2458_v3  ;;  %v700_v8 = vpop.f32.mrb[7].mxu1 }
 0x3ca   :  { %v877_v10 = vmul.f32 0.17677669, %v700_v8 }
 0x3cb   :  { %v886_v12 = vadd.f32 %v878_v6, %v537_v5 }
 0x3cc   :  { %v885_v13 = vadd.f32 %v877_v10, %v536_v9 }
 0x3cd   :  { %v901_v15 = vsel %vm891_vm5, %v886_v12, -inf }
 0x3ce   :  { %902 = vmax.xlane.f32.xlu0 %v901_v15  ;;  %v898_v21 = vsel %vm891_vm5, %v885_v13, -inf }
 0x3d0   :  { %v2465_v18 = vpop.f32.mrb[8].mxu1 }
 0x3d1   :  { %v880_v19 = vmul.f32 0.17677669, %v2465_v18  ;;  %v783_v20 = vpop.f32.mrb[9].mxu1 }
 0x3d2   :  { %v879_v22 = vmul.f32 0.17677669, %v783_v20  ;;  %899 = vmax.xlane.f32.xlu0 %v898_v21 }
 0x3d3   :  { %v888_v25 = vadd.f32 %v880_v19, %v539_v23 }
 0x3d4   :  { %v887_v27 = vadd.f32 %v879_v22, %v538_v26 }
 0x3d5   :  { %v907_v28 = vsel %vm891_vm5, %v888_v25, -inf }
 0x3d6   :  { %908 = vmax.xlane.f32.xlu1 %v907_v28  ;;  %v904_v31 = vsel %vm891_vm5, %v887_v27, -inf }
 0x3d7   :  { %905 = vmax.xlane.f32.xlu0 %v904_v31 }
 0x3d8   :  { %v2472_v33 = vpop.f32.mrb[10].mxu1 }
 0x3d9   :  { %v882_v34 = vmul.f32 0.17677669, %v2472_v33  ;;  %v866_v35 = vpop.f32.mrb[11].mxu1 }
 0x3da   :  { %v881_v36 = vmul.f32 0.17677669, %v866_v35 }
 0x3db   :  { %v890_v38 = vadd.f32 %v882_v34, %v541_v37 }
 0x3dc   :  { %v889_v40 = vadd.f32 %v881_v36, %v540_v39 }
 0x3dd   :  { %v913_v41 = vsel %vm891_vm5, %v890_v38, -inf }
 0x3de   :  { %914 = vmax.xlane.f32.xlu1 %v913_v41  ;;  %v910_v42 = vsel %vm891_vm5, %v889_v40, -inf }
 0x3df   :  { %911 = vmax.xlane.f32.xlu0 %v910_v42 }
 0x3e4   :  { %v897_v43 = vpop.xlane.xlu1 %896 }
 0x3e5   :  { %v917_v44 = vsub.f32 %v884_v60, %v897_v43  ;;  %v894_v47 = vpop.xlane.xlu0 %893 }
 0x3e6   :  { %v916_v48 = vsub.f32 %v883_v61, %v894_v47 }
 0x3e7   :  { %v926_v49 = vmul.f32 1.442695, %v917_v44 }
 0x3e8   :  { %v924_v50 = vmul.f32 1.442695, %v916_v48 }
 0x3e9   :  { %2752 = vpow2.f32 %v926_v49 }
 0x3ea   :  { %2754 = vpow2.f32 %v924_v50 }
 0x3f3   :  { %v2753_v45 = vpop.eup %2752 }
 0x3f4   :  { %v2755_v51 = vpop.eup %2754  ;;  %v943_v11 = vsel %vm891_vm5, %v2753_v45, 0.0 }
 0x3f5   :  { %944 = vadd.xlane.f32.xlu1 %v943_v11  ;;  %v940_v46 = vsel %vm891_vm5, %v2755_v51, 0.0 }
 0x3f6   :  { %941 = vadd.xlane.f32.xlu0 %v940_v46 }
 0x45b   :  { %v903_v52 = vpop.xlane.xlu0 %902 }
 0x45c   :  { %v919_v53 = vsub.f32 %v886_v12, %v903_v52 }
 0x45e   :  { %v930_v54 = vmul.f32 1.442695, %v919_v53 }
 0x45f   :  { %v900_v55 = vpop.xlane.xlu0 %899 }
 0x460   :  { %2756 = vpow2.f32 %v930_v54  ;;  %v918_v56 = vsub.f32 %v885_v13, %v900_v55 }
 0x462   :  { %v928_v57 = vmul.f32 1.442695, %v918_v56 }
 0x463   :  { %v909_v58 = vpop.xlane.xlu1 %908 }
 0x464   :  { %2758 = vpow2.f32 %v928_v57  ;;  %v921_v59 = vsub.f32 %v888_v25, %v909_v58  ;;  %v906_v60 = vpop.xlane.xlu0 %905  ;;  %v2660_v58 = vld [vmem:[#allocation7] sm:$0xff]  }
 0x465   :  { %v920_v61 = vsub.f32 %v887_v27, %v906_v60  ;;  %v2662_v60 = vld [vmem:[#allocation7 + $0x10] sm:$0xff]  }
 0x466   :  { %v934_v62 = vmul.f32 1.442695, %v921_v59  ;;  %v2661_v59 = vld [vmem:[#allocation7 + $0x8] sm:$0xff]  }
 0x467   :  { %v932_v63 = vmul.f32 1.442695, %v920_v61  ;;  %v2663_v61 = vld [vmem:[#allocation7 + $0x18] sm:$0xff]  }
 0x468   :  { %2760 = vpow2.f32 %v934_v62  ;;  %v2664_v62 = vld [vmem:[#allocation7 + $0x20] sm:$0xff]  }
 0x469   :  { %2762 = vpow2.f32 %v932_v63  ;;  %v2665_v63 = vld [vmem:[#allocation7 + $0x28] sm:$0xff]  }
 0x46a   :  { %v3206_v0 = vpop.eup %2756 }
 0x46b   :  { %v915_v1 = vpop.xlane.xlu1 %914  ;;  %v949_v2 = vsel %vm891_vm5, %v3206_v0, 0.0 }
 0x46c   :  { %v923_v3 = vsub.f32 %v890_v38, %v915_v1  ;;  %950 = vadd.xlane.f32.xlu1 %v949_v2  ;;  %v912_v5 = vpop.xlane.xlu0 %911  ;;  %v2667_v1 = vld [vmem:[#allocation7 + $0x38] sm:$0xff]  }
 0x46d   :  { %v922_v6 = vsub.f32 %v889_v40, %v912_v5 }
 0x46e   :  { %v2759_v8 = vpop.eup %2758  ;;  %v938_v9 = vmul.f32 1.442695, %v923_v3 }
 0x46f   :  { %v936_v10 = vmul.f32 1.442695, %v922_v6  ;;  %v946_v12 = vsel %vm891_vm5, %v2759_v8, 0.0 }
 0x470   :  { %2764 = vpow2.f32 %v938_v9  ;;  %947 = vadd.xlane.f32.xlu0 %v946_v12 }
 0x471   :  { %2766 = vpow2.f32 %v936_v10 }
 0x472   :  { %v2761_v13 = vpop.eup %2760 }
 0x473   :  { %v2763_v14 = vpop.eup %2762  ;;  %v955_v15 = vsel %vm891_vm5, %v2761_v13, 0.0 }
 0x474   :  { %956 = vadd.xlane.f32.xlu1 %v955_v15  ;;  %v952_v16 = vsel %vm891_vm5, %v2763_v14, 0.0 }
 0x475   :  { %953 = vadd.xlane.f32.xlu0 %v952_v16 }
 0x47a   :  { %v3213_v17 = vpop.eup %2764 }
 0x47b   :  { %v2767_v18 = vpop.eup %2766  ;;  %v961_v19 = vsel %vm891_vm5, %v3213_v17, 0.0 }
 0x47c   :  { %962 = vadd.xlane.f32.xlu1 %v961_v19  ;;  %v958_v20 = vsel %vm891_vm5, %v2767_v18, 0.0 }
 0x47d   :  { %959 = vadd.xlane.f32.xlu0 %v958_v20 }
 0x482   :  { %v945_v21 = vpop.xlane.xlu1 %944 }
 0x483   :  { %2768 = vrcp.f32 %v945_v21  ;;  %v942_v22 = vpop.xlane.xlu0 %941 }
 0x484   :  { %2770 = vrcp.f32 %v942_v22 }
 0x48d   :  { %v2769_v23 = vpop.eup %2768  ;;  %2604 = vrot.lane.b32.xlu1 %v3119_v7, %s2956_s0 }
 0x48e   :  { %v2771_v24 = vpop.eup %2770  ;;  %v973_v26 = vmul.f32 %v2769_v23, %v2753_v45 }
 0x48f   :  { %v972_v25 = vmul.f32 %v2771_v24, %v2755_v51 }
 0x491   :  { %2609 = vrot.lane.b32.xlu1 %v3119_v7, %s2964_s6  ;;  %2477 = vmatprep.mubr.msk.f32.mxu0 %vm891_vm5, %v972_v25 }
 0x492   :  { %2478 = vmatmul.mubr.msk.f32.vlgmr.msra.gmra.mrb[4].mxu0 %vm891_vm5, %v973_v26 }
 0x493   :  { %2599 = vrot.lane.b32.xlu0 %v3119_v7, %s2962_s5 }
 0x4f9   :  { %v951_v28 = vpop.xlane.xlu1 %950 }
 0x4fd   :  { %v948_v27 = vpop.xlane.xlu0 %947 }
 0x4fe   :  { %2772 = vrcp.f32 %v948_v27 }
 0x501   :  { %v957_v31 = vpop.xlane.xlu1 %956 }
 0x502   :  { %v954_v29 = vpop.xlane.xlu0 %953 }
 0x503   :  { %2774 = vrcp.f32 %v954_v29 }
 0x504   :  { %2776 = vrcp.f32 %v957_v31  ;;  %v2804_v31 = vld [vmem:[#allocation2] sm:$0xff] }
 0x505   :  { %2778 = vrcp.f32 %v951_v28 }
 0x508   :  { %v2773_v32 = vpop.eup %2772 }
 0x509   :  { %v963_v33 = vpop.xlane.xlu1 %962  ;;  %v974_v34 = vmul.f32 %v2773_v32, %v2759_v8 }
 0x50a   :  { %v960_v35 = vpop.xlane.xlu0 %959 }
 0x50b   :  { %2780 = vrcp.f32 %v960_v35  ;;  %2484 = vmatprep.mubr.msk.f32.mxu1 %vm891_vm5, %v974_v34  ;;  %v2805_v35 = vld [vmem:[#allocation2 + $0x8] sm:$0xff] }
 0x50c   :  { %2782 = vrcp.f32 %v963_v33 }
 0x50d   :  { %v2775_v36 = vpop.eup %2774  ;;  %v2605_v37 = vpop.permute.xlu1 %2604 }
 0x50e   :  { %v2607_v38 = vunpack.i.h.bf16 %v2605_v37  ;;  %v2606_v7 = vunpack.i.l.bf16 %v2605_v37  ;;  %v2600_v39 = vpop.permute.xlu0 %2599  ;;  %v976_v40 = vmul.f32 %v2775_v36, %v2763_v14  ;;  %v2777_v44 = vpop.eup %2776 }
 0x50f   :  { %v2602_v41 = vunpack.i.h.bf16 %v2600_v39  ;;  %v2601_v42 = vunpack.i.l.bf16 %v2600_v39  ;;  %v2779_v49 = vpop.eup %2778  ;;  %v977_v51 = vmul.f32 %v2777_v44, %v2761_v13  ;;  %v2671_v39 = vld [vmem:[#allocation8 + $0x8] ss:$16 sps:$4 sm:$0xff]  }
 0x510   :  { %v2553_v43 = vpack.c.bf16 %v2607_v38, %v2606_v7  ;;  %2491 = vmatprep.mubr.msk.f32.mxu0 %vm891_vm5, %v976_v40  ;;  %v975_v52 = vmul.f32 %v2779_v49, %v3206_v0  ;;  %v2666_v0 = vld [vmem:[#allocation7 + $0x30] sm:$0xff]   ;;  %v2673_v40 = vld [vmem:[#allocation8 + $0xc] ss:$16 sps:$4 sm:$0xff]  }
 0x511   :  { %v2549_v47 = vpack.c.bf16 %v2602_v41, %v2601_v42  ;;  %v2610_v48 = vpop.permute.xlu1 %2609  ;;  %v2668_v38 = vld [vmem:[#allocation8] ss:$16 sps:$4 sm:$0xff]   ;;  %v2670_v7 = vld [vmem:[#allocation8 + $0x4] ss:$16 sps:$4 sm:$0xff]  }
 0x512   :  { %v2612_v50 = vunpack.i.h.bf16 %v2610_v48  ;;  %v2611_v45 = vunpack.i.l.bf16 %v2610_v48  ;;  %2554 = vmatprep.subr.bf16.mxu0 %v2553_v43  ;;  %v2676_v41 = vld [vmem:[#allocation8 + $0x24] ss:$16 sps:$4 sm:$0xff]   ;;  %v2674_v42 = vld [vmem:[#allocation8 + $0x20] ss:$16 sps:$4 sm:$0xff]  }
 0x513   :  { %2550 = vmatprep.subr.bf16.mxu1 %v2549_v47  ;;  %2556 = vmatpush3.bf16.msra.mxu0 %v2553_v43  ;;  %v2677_v43 = vld [vmem:[#allocation8 + $0x28] ss:$16 sps:$4 sm:$0xff]  }
 0x514   :  { %v2557_v11 = vpack.c.bf16 %v2612_v50, %v2611_v45  ;;  %2552 = vmatpush3.bf16.msra.mxu1 %v2549_v47  ;;  %2501 = vmatprep.subr.bf16.mxu0 %v2959_v4 }
 0x515   :  { %v2781_v46 = vpop.eup %2780 }
 0x516   :  { %v2783_v53 = vpop.eup %2782  ;;  %2492 = vmatmul.mubr.msk.f32.vlgmr.msra.gmra.mrb[6].mxu0 %vm891_vm5, %v977_v51  ;;  %2558 = vmatprep.subr.bf16.mxu1 %v2557_v11  ;;  %v978_v54 = vmul.f32 %v2781_v46, %v2767_v18  ;;  %v2682_v46 = vld [vmem:[#allocation8 + $0x44] ss:$16 sps:$4 sm:$0xff]  }
 0x517   :  { %2485 = vmatmul.mubr.msk.f32.vlgmr.msra.gmra.mrb[12].mxu1 %vm891_vm5, %v975_v52  ;;  %2517 = vmatprep.mubr.msk.bf16.mxu0 %vm2961_vm0, %v2959_v4  ;;  %v979_v55 = vmul.f32 %v2783_v53, %v3213_v17  ;;  %v2685_v52 = vld [vmem:[#allocation8 + $0x4c] ss:$16 sps:$4 sm:$0xff]   ;;  %v2680_v53 = vld [vmem:[#allocation8 + $0x40] ss:$16 sps:$4 sm:$0xff]  }
 0x518   :  { %2560 = vmatpush3.bf16.msra.mxu1 %v2557_v11  ;;  %2498 = vmatprep.mubr.msk.f32.mxu1 %vm891_vm5, %v978_v54  ;;  %v2683_v54 = vld [vmem:[#allocation8 + $0x48] ss:$16 sps:$4 sm:$0xff]  }
 0x519   :  { %2502 = vmatpush3.bf16.msra.mxu0 %v2660_v58  ;;  %1677 = vmatprep.subr.bf16.mxu1 %v2670_v7  ;;  %v2689_v58 = vld [vmem:[#allocation8 + $0x68] ss:$16 sps:$4 sm:$0xff]  }
 0x51a   :  { %2503 = vmatprep.subr.bf16.mxu0 %v2959_v4  ;;  %v2722_v7 = vld [vmem:[#allocation10 + $0x8] sm:$0xff]  }
 0x51b   :  { %2499 = vmatmul.mubr.msk.f32.vlgmr.msra.gmra.mrb[14].mxu1 %vm891_vm5, %v979_v55  ;;  %v2688_v55 = vld [vmem:[#allocation8 + $0x64] ss:$16 sps:$4 sm:$0xff]  }
 0x51c   :  { %1709 = vmatprep.mubr.bf16.mxu1 %v2960_v30  ;;  %1678 = vmatpush1.bf16.msra.mxu1 %v2668_v38  ;;  %v2721_v38 = vld [vmem:[#allocation10 + $0xc8] sm:$0xff]  }
 0x51d   :  { %2504 = vmatpush3.bf16.msra.mxu0 %v2661_v59  ;;  %1679 = vmatprep.subr.bf16.mxu1 %v2676_v41  ;;  %v2694_v59 = vld [vmem:[#allocation8 + $0x84] ss:$16 sps:$4 sm:$0xff]  }
 0x51e   :  { %2505 = vmatprep.subr.bf16.mxu0 %v2959_v4  ;;  %v2725_v41 = vld [vmem:[#allocation10 + $0xd0] sm:$0xff]  }
 0x520   :  { %1680 = vmatpush1.bf16.msra.mxu1 %v2674_v42  ;;  %v2727_v42 = vld [vmem:[#allocation10 + $0x90] sm:$0xff]  }
 0x521   :  { %2506 = vmatpush3.bf16.msra.mxu0 %v2662_v60  ;;  %1681 = vmatprep.subr.bf16.mxu1 %v2682_v46  ;;  %v2697_v60 = vld [vmem:[#allocation8 + $0x8c] ss:$16 sps:$4 sm:$0xff]  }
 0x522   :  { %2507 = vmatprep.subr.bf16.mxu0 %v2959_v4  ;;  %v2737_v46 = vld [vmem:[#allocation10 + $0xe8] sm:$0xff]  }
 0x524   :  { %1682 = vmatpush1.bf16.msra.mxu1 %v2680_v53  ;;  %v2739_v53 = vld [vmem:[#allocation10 + $0xa8] sm:$0xff]  }
 0x525   :  { %2508 = vmatpush3.bf16.msra.mxu0 %v2663_v61  ;;  %1683 = vmatprep.subr.bf16.mxu1 %v2688_v55  ;;  %v2692_v61 = vld [vmem:[#allocation8 + $0x80] ss:$16 sps:$4 sm:$0xff]  }
 0x526   :  { %2509 = vmatprep.subr.bf16.mxu0 %v2959_v4  ;;  %v2741_v55 = vld [vmem:[#allocation10 + $0xf0] sm:$0xff]  }
 0x529   :  { %2510 = vmatpush3.bf16.msra.mxu0 %v2664_v62  ;;  %v2695_v62 = vld [vmem:[#allocation8 + $0x88] ss:$16 sps:$4 sm:$0xff]  }
 0x52a   :  { %2511 = vmatprep.subr.bf16.mxu0 %v2959_v4 }
 0x52d   :  { %2512 = vmatpush3.bf16.msra.mxu0 %v2665_v63  ;;  %v2700_v63 = vld [vmem:[#allocation8 + $0xa4] ss:$16 sps:$4 sm:$0xff]  }
 0x52e   :  { %2513 = vmatprep.subr.bf16.mxu0 %v2959_v4 }
 0x531   :  { %2514 = vmatpush3.bf16.msra.mxu0 %v2666_v0  ;;  %v2703_v0 = vld [vmem:[#allocation8 + $0xac] ss:$16 sps:$4 sm:$0xff]  }
 0x532   :  { %2515 = vmatprep.subr.bf16.mxu0 %v2959_v4 }
 0x535   :  { %2516 = vmatpush3.bf16.msra.mxu0 %v2667_v1  ;;  %v2698_v1 = vld [vmem:[#allocation8 + $0xa0] ss:$16 sps:$4 sm:$0xff]  }
 0x536   :  { %1720 = vmatprep.subr.bf16.mxu0 %v2673_v40  ;;  %v2724_v40 = vld [vmem:[#allocation10 + $0x50] sm:$0xff]  }
 0x565   :  { %v2479_v56 = vpop.f32.mrb[4].mxu0 }
 0x566   :  { %v1052_v57 = vpop.f32.mrb[5].mxu0 }
 0x5e9   :  { %v2493_v2 = vpop.f32.mrb[6].mxu0 }
 0x5ea   :  { %v2486_v3 = vpop.f32.mrb[12].mxu1  ;;  %v1214_v5 = vpop.f32.mrb[7].mxu0 }
 0x5eb   :  { %v2618_v6 = vpack.i.bf16 %v2493_v2, %v1214_v5  ;;  %v1133_v8 = vpop.f32.mrb[13].mxu1  ;;  %v2701_v2 = vld [vmem:[#allocation8 + $0xa8] ss:$16 sps:$4 sm:$0xff]   ;;  %v2709_v5 = vld [vmem:[#allocation8 + $0xcc] ss:$16 sps:$4 sm:$0xff]  }
 0x5ec   :  { %v2613_v9 = vpack.i.bf16 %v2486_v3, %v1133_v8  ;;  %v2706_v3 = vld [vmem:[#allocation8 + $0xc4] ss:$16 sps:$4 sm:$0xff]   ;;  %v2707_v8 = vld [vmem:[#allocation8 + $0xc8] ss:$16 sps:$4 sm:$0xff]  }
 0x5ed   :  { %2619 = vrot.lane.b32.xlu0 %v2618_v6, %s2956_s0  ;;  %v2704_v6 = vld [vmem:[#allocation8 + $0xc0] ss:$16 sps:$4 sm:$0xff]  }
 0x5ee   :  { %2614 = vrot.lane.b32.xlu1 %v2613_v9, %s2964_s6  ;;  %v2500_v10 = vpop.f32.mrb[14].mxu1  ;;  %v2712_v9 = vld [vmem:[#allocation8 + $0xe4] ss:$16 sps:$4 sm:$0xff]  }
 0x5ef   :  { %v1295_v12 = vpop.f32.mrb[15].mxu1 }
 0x5f0   :  { %v2623_v13 = vpack.i.bf16 %v2500_v10, %v1295_v12  ;;  %v2710_v10 = vld [vmem:[#allocation8 + $0xe0] ss:$16 sps:$4 sm:$0xff]   ;;  %v2713_v12 = vld [vmem:[#allocation8 + $0xe8] ss:$16 sps:$4 sm:$0xff]  }
 0x5f2   :  { %2624 = vrot.lane.b32.xlu1 %v2623_v13, %s2962_s5  ;;  %v2715_v13 = vld [vmem:[#allocation8 + $0xec] ss:$16 sps:$4 sm:$0xff]  }
 0x65f   :  { %v2620_v15 = vpop.permute.xlu0 %2619 }
 0x660   :  { %v2615_v14 = vpop.permute.xlu1 %2614  ;;  %v2622_v19 = vunpack.i.h.bf16 %v2620_v15  ;;  %v2621_v20 = vunpack.i.l.bf16 %v2620_v15 }
 0x661   :  { %v2617_v4 = vunpack.i.h.bf16 %v2615_v14  ;;  %v2616_v16 = vunpack.i.l.bf16 %v2615_v14 }
 0x663   :  { %v1329_v17 = vsel %vm542_vm1, %v2479_v56, %v2617_v4  ;;  %v1328_v18 = vsel %vm542_vm1, %v1052_v57, %v2616_v16  ;;  %v2691_v56 = vld [vmem:[#allocation8 + $0x6c] ss:$16 sps:$4 sm:$0xff]   ;;  %v2686_v57 = vld [vmem:[#allocation8 + $0x60] ss:$16 sps:$4 sm:$0xff]  }
 0x664   :  { %v2625_v21 = vpop.permute.xlu1 %2624  ;;  %v1331_v24 = vsel %vm1330_vm6, %v1328_v18, %v2621_v20  ;;  %v1332_v25 = vsel %vm1330_vm6, %v1329_v17, %v2622_v19  ;;  %1684 = vmatpush1.bf16.msra.mxu1 %v2686_v57  ;;  %v2743_v57 = vld [vmem:[#allocation10 + $0xb0] sm:$0xff]  }
 0x665   :  { %v2627_v22 = vunpack.i.h.bf16 %v2625_v21  ;;  %v2626_v23 = vunpack.i.l.bf16 %v2625_v21  ;;  %1685 = vmatprep.subr.bf16.mxu1 %v2694_v59  ;;  %v2265_v21 = vld [vmem:[%s3355_s7] ss:$0 sm:$0xff]  ;;  %v2745_v59 = vld [vmem:[#allocation10 + $0xf8] sm:$0xff]   ;;  %s2965_s7 = smov [#allocation11]  }
 0x667   :  { %v1335_v26 = vsel %vm1333_vm7, %v1332_v25, %v2627_v22  ;;  %v1334_v27 = vsel %vm1333_vm7, %v1331_v24, %v2626_v23  ;;  %v2266_v25 = vld [vmem:[%s3356_s8] ss:$0 sm:$0xff]  ;;  %s2186_s8 = sshll.u32 %s2965_s7, 4  ;;  %s2187_s8 = int_to_ptr.vmem [resolvable:$true] %s2186_s8 }
 0x668   :  { %v1336_v28 = vpack.c.bf16 %v1335_v26, %v1334_v27  ;;  %1686 = vmatpush1.bf16.msra.mxu1 %v2692_v61  ;;  %v2747_v61 = vld [vmem:[#allocation10 + $0xb8] sm:$0xff]   ;;  %s2916_s23 = scalar_lea.vmem %s2187_s8, 256  ;;  %p2921_p13 = scmp.lt.s32.totalorder %s2187_s8, %s2187_s8 }
 0x669   :  { %1687 = vmatprep.subr.bf16.mxu1 %v2700_v63  ;;  %p2917_p12 = scmp.ne.s32.totalorder %s2187_s8, %s2916_s23  ;;  %p2922_p0 = scmp.lt.s32.totalorder %s2916_s23, %s2916_s23 }
 0x66a   :  { %2518 = vmatmul.mubr.bf16.vlgmr.msra.gmra.mrb[8].mxu0 %v1336_v28 }
 0x66b   :  { %1752 = vmatprep.mubr.bf16.mxu0 %v2960_v30  ;;  %v2679_v30 = vld [vmem:[#allocation8 + $0x2c] ss:$16 sps:$4 sm:$0xff]   ;;  %1721 = vmatpush1.bf16.msra.mxu0 %v2671_v39  ;;  %p2923_p1 = por %p2922_p0, %p2921_p13 }
 0x66c   :  { %1722 = vmatprep.subr.bf16.mxu0 %v2679_v30  ;;  %1688 = vmatpush1.bf16.msra.mxu1 %v2698_v1  ;;  %v2723_v39 = vld [vmem:[#allocation10 + $0x88] sm:$0xff]   ;;  %v2726_v30 = vld [vmem:[#allocation10 + $0x10] sm:$0xff]  }
 0x66d   :  { %1689 = vmatprep.subr.bf16.mxu1 %v2706_v3  ;;  %p2924_p2 = pnand %p2923_p1, %p2917_p12 }
 0x66f   :  { %1723 = vmatpush1.bf16.msra.mxu0 %v2677_v43  ;;  %v2728_v43 = vld [vmem:[#allocation10 + $0x58] sm:$0xff]  }
 0x670   :  { %1724 = vmatprep.subr.bf16.mxu0 %v2685_v52  ;;  %1690 = vmatpush1.bf16.msra.mxu1 %v2704_v6  ;;  %v2738_v52 = vld [vmem:[#allocation10 + $0x28] sm:$0xff]  }
 0x671   :  { %1691 = vmatprep.subr.bf16.mxu1 %v2712_v9 }
 0x673   :  { %1725 = vmatpush1.bf16.msra.mxu0 %v2683_v54  ;;  %v2740_v54 = vld [vmem:[#allocation10 + $0x70] sm:$0xff]  }
 0x674   :  { %1726 = vmatprep.subr.bf16.mxu0 %v2691_v56  ;;  %1692 = vmatpush1.bf16.msra.mxu1 %v2710_v10  ;;  %v2742_v56 = vld [vmem:[#allocation10 + $0x30] sm:$0xff]  }
 0x677   :  { %1727 = vmatpush1.bf16.msra.mxu0 %v2689_v58  ;;  %v2744_v58 = vld [vmem:[#allocation10 + $0x78] sm:$0xff]  }
 0x678   :  { %1728 = vmatprep.subr.bf16.mxu0 %v2697_v60  ;;  %v2746_v60 = vld [vmem:[#allocation10 + $0x38] sm:$0xff]  }
 0x67b   :  { %1729 = vmatpush1.bf16.msra.mxu0 %v2695_v62 }
 0x67c   :  { %1730 = vmatprep.subr.bf16.mxu0 %v2703_v0 }
 0x67f   :  { %1731 = vmatpush1.bf16.msra.mxu0 %v2701_v2 }
 0x680   :  { %1732 = vmatprep.subr.bf16.mxu0 %v2709_v5 }
 0x683   :  { %1733 = vmatpush1.bf16.msra.mxu0 %v2707_v8 }
 0x684   :  { %1734 = vmatprep.subr.bf16.mxu0 %v2715_v13 }
 0x687   :  { %1735 = vmatpush1.bf16.msra.mxu0 %v2713_v12 }
 0x73d   :  { %v1435_v29 = vpop.f32.mrb[8].mxu0 }
 0x73e   :  { %v3251_v32 = vadd.f32 %v2804_v31, %v1435_v29  ;;  %v2519_v33 = vpop.f32.mrb[9].mxu0  ;;  %v2716_v31 = vld [vmem:[#allocation10 + $0x40] sm:$0xff]  }
 0x73f   :  { %v1438_v34 = vpop.f32.mrb[10].mxu0  ;;  %v2717_v33 = vld [vmem:[#allocation10 + $0xc0] sm:$0xff]   ;;  %2381 = vmatprep.subr.bf16.mxu1 %v2716_v31 }
 0x740   :  { %v3253_v36 = vadd.f32 %v2805_v35, %v1438_v34  ;;  %1446 = vadd.xlane.f32.xlu0 %v3251_v32  ;;  %v2520_v37 = vpop.f32.mrb[11].mxu0  ;;  %2403 = vmatprep.subr.bf16.mxu0 %v2717_v33  ;;  %v2718_v34 = vld [vmem:[#allocation10] sm:$0xff]  }
 0x741   :  { %v2719_v35 = vld [vmem:[#allocation10 + $0x80] sm:$0xff]   ;;  %v2720_v37 = vld [vmem:[#allocation10 + $0x48] sm:$0xff]  }
 0x742   :  { %1448 = vadd.xlane.f32.xlu1 %v3253_v36 }
 0x7cd   :  { %v1447_v44 = vpop.xlane.xlu0 %1446 }
 0x7ce   :  { %v1450_v47 = vmul.f32 0.0078125, %v1447_v44  ;;  %v2729_v44 = vld [vmem:[#allocation10 + $0xd8] sm:$0xff]  }
 0x7cf   :  { %v1449_v48 = vpop.xlane.xlu1 %1448 }
 0x7d0   :  { %v3258_v49 = vsub.f32 %v3251_v32, %v1450_v47  ;;  %v1451_v50 = vmul.f32 0.0078125, %v1449_v48  ;;  %v2730_v47 = vld [vmem:[#allocation10 + $0x18] sm:$0xff]  }
 0x7d1   :  { %v2731_v48 = vld [vmem:[#allocation10 + $0x98] sm:$0xff]  }
 0x7d2   :  { %v3261_v45 = vsub.f32 %v3253_v36, %v1451_v50  ;;  %v1454_v51 = vmul.f32 %v3258_v49, %v3258_v49  ;;  %v2733_v50 = vld [vmem:[#allocation10 + $0xe0] sm:$0xff]  }
 0x7d4   :  { %1456 = vadd.xlane.f32.xlu0 %v1454_v51  ;;  %v1455_v11 = vmul.f32 %v3261_v45, %v3261_v45  ;;  %v2735_v51 = vld [vmem:[#allocation10 + $0xa0] sm:$0xff]  }
 0x7d8   :  { %1458 = vadd.xlane.f32.xlu0 %v1455_v11  ;;  %v2736_v11 = vld [vmem:[#allocation10 + $0x68] sm:$0xff]  }
 0x861   :  { %v1457_v14 = vpop.xlane.xlu0 %1456 }
 0x862   :  { %v1460_v15 = vmul.f32 0.0078125, %v1457_v14 }
 0x864   :  { %v1462_v4 = vadd.f32 1e-05, %v1460_v15 }
 0x865   :  { %v1459_v16 = vpop.xlane.xlu0 %1458 }
 0x866   :  { %2784 = vrsqrt.f32 %v1462_v4  ;;  %v1461_v17 = vmul.f32 0.0078125, %v1459_v16 }
 0x868   :  { %v1463_v18 = vadd.f32 1e-05, %v1461_v17 }
 0x86a   :  { %2786 = vrsqrt.f32 %v1463_v18 }
 0x870   :  { %v2785_v19 = vpop.eup %2784 }
 0x871   :  { %v1466_v20 = vmul.f32 %v2785_v19, %v3258_v49  ;;  %v2732_v49 = vld [vmem:[#allocation10 + $0x60] sm:$0xff]  }
 0x873   :  { %v1474_v24 = vmul.f32 %v2265_v21, %v1466_v20 }
 0x874   :  { %v2787_v22 = vpop.eup %2786 }
 0x875   :  { %v1467_v23 = vmul.f32 %v2787_v22, %v3261_v45  ;;  %v1482_v27 = vadd.f32 %v2266_v25, %v1474_v24  ;;  %v2734_v45 = vld [vmem:[#allocation10 + $0x20] sm:$0xff]  }
 0x877   :  { %v1475_v26 = vmul.f32 %v2265_v21, %v1467_v23 }
 0x879   :  { %v1483_v28 = vadd.f32 %v2266_v25, %v1475_v26 }
 0x87b   :  { %v1484_v29 = vpack.c.bf16 %v1483_v28, %v1482_v27 }
 0x87d   :  { %1710 = vmatmul.mubr.bf16.vlgmr.msra.gmra.mrb[16].mxu1 %v1484_v29  ;;  %1753 = vmatmul.mubr.bf16.vlgmr.msra.gmra.mrb[12].mxu0 %v1484_v29 }
 0x87e   :  { %2382 = vmatpush3.bf16.msra.mxu1 %v2718_v34  ;;  %2404 = vmatpush3.bf16.msra.mxu0 %v2719_v35 }
 0x87f   :  { %2383 = vmatprep.subr.bf16.mxu1 %v2720_v37  ;;  %2405 = vmatprep.subr.bf16.mxu0 %v2721_v38 }
 0x882   :  { %2384 = vmatpush3.bf16.msra.mxu1 %v2722_v7  ;;  %2406 = vmatpush3.bf16.msra.mxu0 %v2723_v39 }
 0x883   :  { %2385 = vmatprep.subr.bf16.mxu1 %v2724_v40  ;;  %2407 = vmatprep.subr.bf16.mxu0 %v2725_v41 }
 0x886   :  { %2386 = vmatpush3.bf16.msra.mxu1 %v2726_v30  ;;  %2408 = vmatpush3.bf16.msra.mxu0 %v2727_v42 }
 0x887   :  { %2387 = vmatprep.subr.bf16.mxu1 %v2728_v43  ;;  %2409 = vmatprep.subr.bf16.mxu0 %v2729_v44 }
 0x88a   :  { %2388 = vmatpush3.bf16.msra.mxu1 %v2730_v47  ;;  %2410 = vmatpush3.bf16.msra.mxu0 %v2731_v48 }
 0x88b   :  { %2389 = vmatprep.subr.bf16.mxu1 %v2732_v49  ;;  %2411 = vmatprep.subr.bf16.mxu0 %v2733_v50 }
 0x88e   :  { %2390 = vmatpush3.bf16.msra.mxu1 %v2734_v45  ;;  %2412 = vmatpush3.bf16.msra.mxu0 %v2735_v51 }
 0x88f   :  { %2391 = vmatprep.subr.bf16.mxu1 %v2736_v11  ;;  %2413 = vmatprep.subr.bf16.mxu0 %v2737_v46 }
 0x892   :  { %2392 = vmatpush3.bf16.msra.mxu1 %v2738_v52  ;;  %2414 = vmatpush3.bf16.msra.mxu0 %v2739_v53 }
 0x893   :  { %2393 = vmatprep.subr.bf16.mxu1 %v2740_v54  ;;  %2415 = vmatprep.subr.bf16.mxu0 %v2741_v55 }
 0x896   :  { %2394 = vmatpush3.bf16.msra.mxu1 %v2742_v56  ;;  %2416 = vmatpush3.bf16.msra.mxu0 %v2743_v57 }
 0x897   :  { %2395 = vmatprep.subr.bf16.mxu1 %v2744_v58  ;;  %2417 = vmatprep.subr.bf16.mxu0 %v2745_v59 }
 0x89a   :  { %2396 = vmatpush3.bf16.msra.mxu1 %v2746_v60  ;;  %2418 = vmatpush3.bf16.msra.mxu0 %v2747_v61 }
 0x950   :  { %v3275_v62 = vpop.f32.mrb[16].mxu1  ;;  %v3277_v63 = vpop.f32.mrb[12].mxu0 }
 0x951   :  { %v1763_v0 = vmul.f32 %v3275_v62, %v3275_v62  ;;  %v1765_v1 = vmul.f32 %v3277_v63, %v3277_v63  ;;  %v3283_v2 = vpop.f32.mrb[17].mxu1  ;;  %v3285_v3 = vpop.f32.mrb[13].mxu0 }
 0x952   :  { %v1764_v5 = vmul.f32 %v3283_v2, %v3283_v2  ;;  %v1766_v6 = vmul.f32 %v3285_v3, %v3285_v3  ;;  %v3291_v8 = vpop.f32.mrb[18].mxu1  ;;  %v3293_v9 = vpop.f32.mrb[14].mxu0 }
 0x953   :  { %v1771_v10 = vmul.f32 %v1763_v0, %v3275_v62  ;;  %v1773_v12 = vmul.f32 %v1765_v1, %v3277_v63  ;;  %v1767_v13 = vmul.f32 %v3291_v8, %v3291_v8  ;;  %v1769_v14 = vmul.f32 %v3293_v9, %v3293_v9  ;;  %v3301_v15 = vpop.f32.mrb[19].mxu1  ;;  %v3303_v4 = vpop.f32.mrb[15].mxu0 }
 0x954   :  { %v1772_v16 = vmul.f32 %v1764_v5, %v3283_v2  ;;  %v1774_v17 = vmul.f32 %v1766_v6, %v3285_v3  ;;  %v1768_v18 = vmul.f32 %v3301_v15, %v3301_v15  ;;  %v1770_v19 = vmul.f32 %v3303_v4, %v3303_v4 }
 0x955   :  { %v1779_v20 = vmul.f32 0.044715, %v1771_v10  ;;  %v1781_v21 = vmul.f32 0.044715, %v1773_v12  ;;  %v1775_v22 = vmul.f32 %v1767_v13, %v3291_v8  ;;  %v1777_v23 = vmul.f32 %v1769_v14, %v3293_v9 }
 0x956   :  { %v1780_v24 = vmul.f32 0.044715, %v1772_v16  ;;  %v1782_v25 = vmul.f32 0.044715, %v1774_v17  ;;  %v1776_v26 = vmul.f32 %v1768_v18, %v3301_v15  ;;  %v1778_v27 = vmul.f32 %v1770_v19, %v3303_v4 }
 0x957   :  { %v1787_v28 = vadd.f32 %v1779_v20, %v3275_v62  ;;  %v1789_v29 = vadd.f32 %v1781_v21, %v3277_v63  ;;  %v1783_v31 = vmul.f32 0.044715, %v1775_v22  ;;  %v1785_v33 = vmul.f32 0.044715, %v1777_v23 }
 0x958   :  { %v1788_v34 = vadd.f32 %v1780_v24, %v3283_v2  ;;  %v1790_v35 = vadd.f32 %v1782_v25, %v3285_v3  ;;  %v1784_v37 = vmul.f32 0.044715, %v1776_v26  ;;  %v1786_v38 = vmul.f32 0.044715, %v1778_v27 }
 0x959   :  { %v1795_v7 = vmul.f32 0.7978846, %v1787_v28  ;;  %v1797_v39 = vmul.f32 0.7978846, %v1789_v29  ;;  %v1791_v40 = vadd.f32 %v1783_v31, %v3291_v8  ;;  %v1793_v41 = vadd.f32 %v1785_v33, %v3293_v9 }
 0x95a   :  { %v1796_v30 = vmul.f32 0.7978846, %v1788_v34  ;;  %v1798_v42 = vmul.f32 0.7978846, %v1790_v35  ;;  %v1792_v43 = vadd.f32 %v1784_v37, %v3301_v15  ;;  %v1794_v44 = vadd.f32 %v1786_v38, %v3303_v4 }
 0x95b   :  { %2788 = vtanh.f32 %v1795_v7  ;;  %v1799_v47 = vmul.f32 0.7978846, %v1791_v40  ;;  %v1801_v48 = vmul.f32 0.7978846, %v1793_v41 }
 0x95c   :  { %2790 = vtanh.f32 %v1797_v39  ;;  %v1800_v49 = vmul.f32 0.7978846, %v1792_v43  ;;  %v1802_v50 = vmul.f32 0.7978846, %v1794_v44 }
 0x95d   :  { %2792 = vtanh.f32 %v1796_v30 }
 0x95e   :  { %2794 = vtanh.f32 %v1798_v42 }
 0x95f   :  { %2796 = vtanh.f32 %v1799_v47 }
 0x960   :  { %2798 = vtanh.f32 %v1801_v48 }
 0x961   :  { %2800 = vtanh.f32 %v1800_v49 }
 0x962   :  { %2802 = vtanh.f32 %v1802_v50 }
 0x965   :  { %v2789_v45 = vpop.eup %2788 }
 0x966   :  { %v2791_v51 = vpop.eup %2790  ;;  %v1811_v11 = vadd.f32 1.0, %v2789_v45 }
 0x967   :  { %v2793_v46 = vpop.eup %2792  ;;  %v1813_v52 = vadd.f32 1.0, %v2791_v51 }
 0x968   :  { %v2795_v53 = vpop.eup %2794  ;;  %v1812_v54 = vadd.f32 1.0, %v2793_v46  ;;  %v1819_v58 = vmul.f32 0.5, %v1811_v11 }
 0x969   :  { %v2797_v55 = vpop.eup %2796  ;;  %v1814_v56 = vadd.f32 1.0, %v2795_v53  ;;  %v1821_v61 = vmul.f32 0.5, %v1813_v52 }
 0x96a   :  { %v2799_v57 = vpop.eup %2798  ;;  %v1815_v59 = vadd.f32 1.0, %v2797_v55  ;;  %v1820_v5 = vmul.f32 0.5, %v1812_v54  ;;  %v1827_v16 = vmul.f32 %v1819_v58, %v3275_v62 }
 0x96b   :  { %v2801_v60 = vpop.eup %2800  ;;  %v1817_v0 = vadd.f32 1.0, %v2799_v57  ;;  %v1822_v12 = vmul.f32 0.5, %v1814_v56  ;;  %v1829_v19 = vmul.f32 %v1821_v61, %v3277_v63 }
 0x96c   :  { %v2803_v1 = vpop.eup %2802  ;;  %v1823_v6 = vmul.f32 0.5, %v1815_v59  ;;  %v1816_v10 = vadd.f32 1.0, %v2801_v60  ;;  %v1828_v22 = vmul.f32 %v1820_v5, %v3283_v2 }
 0x96d   :  { %v1825_v13 = vmul.f32 0.5, %v1817_v0  ;;  %v1818_v14 = vadd.f32 1.0, %v2803_v1  ;;  %v1830_v25 = vmul.f32 %v1822_v12, %v3285_v3 }
 0x96e   :  { %v1831_v17 = vmul.f32 %v1823_v6, %v3291_v8  ;;  %v1824_v18 = vmul.f32 0.5, %v1816_v10 }
 0x96f   :  { %v1833_v20 = vmul.f32 %v1825_v13, %v3293_v9  ;;  %v1826_v21 = vmul.f32 0.5, %v1818_v14 }
 0x970   :  { %v1832_v23 = vmul.f32 %v1824_v18, %v3301_v15  ;;  %v1835_v24 = vpack.c.bf16 %v1831_v17, %v1827_v16 }
 0x971   :  { %v1834_v26 = vmul.f32 %v1826_v21, %v3303_v4  ;;  %v1837_v27 = vpack.c.bf16 %v1833_v20, %v1829_v19 }
 0x972   :  { %v1836_v28 = vpack.c.bf16 %v1832_v23, %v1828_v22 }
 0x973   :  { %v1838_v62 = vpack.c.bf16 %v1834_v26, %v1830_v25 }
 0x974   :  { %2127 = vmatprep.mubr.bf16.mxu1 %v1836_v28 }
 0x975   :  { %2168 = vmatprep.mubr.bf16.mxu0 %v1838_v62  ;;  %2128 = vmatmul.mubr.bf16.vlgmr.msra.gmra.mrb[20].mxu1 %v1835_v24 }
 0x976   :  { %2169 = vmatmul.mubr.bf16.vlgmr.msra.gmra.mrb[16].mxu0 %v1837_v27 }
 0xa48   :  { %v2397_v63 = vpop.f32.mrb[20].mxu1 }
 0xa49   :  { %v2419_v8 = vpop.f32.mrb[16].mxu0  ;;  %v2398_v9 = vpop.f32.mrb[21].mxu1 }
 0xa4a   :  { %v2399_v29 = vadd.f32 %v2398_v9, %v2397_v63  ;;  %v2420_v31 = vpop.f32.mrb[17].mxu0  ;;  %v2400_v2 = vpop.f32.mrb[22].mxu1 }
 0xa4b   :  { %v2421_v33 = vadd.f32 %v2420_v31, %v2419_v8  ;;  %v2422_v15 = vpop.f32.mrb[18].mxu0  ;;  %v2401_v34 = vpop.f32.mrb[23].mxu1 }
 0xa4c   :  { %v2402_v35 = vadd.f32 %v2401_v34, %v2400_v2  ;;  %v2423_v3 = vpop.f32.mrb[19].mxu0 }
 0xa4d   :  { %v2171_v37 = vadd.f32 %v2421_v33, %v2399_v29  ;;  %v2424_v4 = vadd.f32 %v2423_v3, %v2422_v15 }
 0xa4f   :  { %v2177_v38 = vadd.f32 %v2171_v37, %v3251_v32  ;;  %v2174_v7 = vadd.f32 %v2424_v4, %v2402_v35 }
 0xa51   :  { %2179 = vst [vmem:[#allocation11] sm:$0xff] %v2177_v38  ;;  %v2178_v39 = vadd.f32 %v2174_v7, %v3253_v36 }
 0xa53   :  { %2180 = vst [vmem:[#allocation11 + $0x8] sm:$0xff] %v2178_v39 }
 0xa54   :  { %2927 = shalt.err (!%p2924_p2)
}
 0xa55   :  { %s2928_s26 = scalar_lea.hbm %s3358_s10, 256 }
 0xa56   :  { %p2929_p3 = scmp.ne.s32.totalorder %s3358_s10, %s2928_s26  ;;  %p2932_p4 = scmp.lt.u32.totalorder %s2928_s26, %s3358_s10 }
 0xa58   :  { %p2934_p5 = pnand %p2932_p4, %p2929_p3 }
 0xa5a   :  { %2937 = shalt.err (!%p2934_p5)
}
 0xa5b   :  { %2192 = dma.vmem_to_hbm [thread:$0]  %s2187_s8, 256, %s3358_s10, [#allocation4], %s2953_s3, %s2953_s3, %s2954_s28  }
 0xa5c   :  { %2944 = dma.done.wait [#allocation4], 256  }
 0xa5d   :  { %2945 = vsyncadd [#allocation4], 4294967040 }
 0xa5e   :  { %2196 = vsyncpa [#allocation3], 1 }
 0xa5f   :  { %2197 = vsyncpa [#allocation6], 1 }
 0xa60   :  { %2198 = vsyncpa [#allocation9], 1 }
 0xa61   :  { %2199 = vsyncpa [#allocation4], 1 }

</bundles_post_ra>
